<compile_context>
chip_gen: v7x
topology: tpu7x:2x2x1
jax: 0.10.0
libtpu: 0.0.40
codegen_flags: <defaults>
</compile_context>

<pallas_src>
import functools

import jax
import jax.numpy as jnp
from jax import lax
from jax.experimental import pallas as pl
from jax.experimental.pallas import tpu as pltpu


# Row layout of the packed small-parameter array (see prepare_decoder_params).
_ROW_FF_B1, _ROW_FF_B2 = 0, 1
_ROW_LN1_G, _ROW_LN1_B = 2, 3
_ROW_LN3_G, _ROW_LN3_B = 4, 5
_ROW_LN2_G, _ROW_LN2_B = 6, 7


# ------------------------------ fused kernel ------------------------------- #

def _decoder_layer_kernel(*refs, num_heads, head_dim, ff_dim, eps, has_cross,
                          matmul_dtype):
    if has_cross:
        (x_ref, enc_ref,
         sa_wqkv, sa_wo,
         ca_wq, ca_wkv, ca_wo,
         w1, w2, vec, o_ref) = refs
    else:
        (x_ref, sa_wqkv, sa_wo, w1, w2, vec, o_ref) = refs
        enc_ref = ca_wq = ca_wkv = ca_wo = None

    md = matmul_dtype
    H, Dh, F = num_heads, head_dim, ff_dim
    approx = md != jnp.float32
    inv_scale = jnp.float32(1.0 / (Dh ** 0.5))

    x = x_ref[0].astype(jnp.float32)                       # (S, E) f32
    S, E = x.shape

    def softmax_rows(s):                                    # s: (S, Skv) f32
        s = s - jnp.max(s, axis=-1, keepdims=True)
        p = jnp.exp(s)
        l = jnp.sum(p, axis=-1, keepdims=True)
        if approx:
            inv = pl.reciprocal(l, approx=True)             # EUP slot (bf16 path)
        else:
            inv = 1.0 / l                                   # exact (f32 path, 1e-4)
        return p * inv

    def attn_core(q_f32, k_f32, v_f32, wo_ref):
        # q_f32: (S, E) pre-scaled; k_f32/v_f32: (Skv, E); wo_ref: (E, E) in md.
        # Per-head static lane slices of the full-width projections; the
        # head-concat is folded into the accumulated Wo row-slab contractions.
        q = q_f32.astype(md)
        k = k_f32.astype(md)
        v = v_f32.astype(md)
        out = None
        for h in range(H):
            sl = slice(h * Dh, (h + 1) * Dh)
            s = jnp.einsum('sd,td->st', q[:, sl], k[:, sl],
                           preferred_element_type=jnp.float32)   # (S, Skv)
            p = softmax_rows(s)
            a = jnp.einsum('st,td->sd', p.astype(md), v[:, sl],
                           preferred_element_type=jnp.float32)   # (S, Dh)
            oh = jnp.einsum('sd,de->se', a.astype(md), wo_ref[sl, :],
                            preferred_element_type=jnp.float32)  # (S, E)
            out = oh if out is None else out + oh
        return out

    def add_ln(a, res, g_row, b_row):
        y = a + res
        mu = jnp.mean(y, axis=-1, keepdims=True)
        yc = y - mu
        var = jnp.mean(yc * yc, axis=-1, keepdims=True)
        return (yc * lax.rsqrt(var + eps) * vec[g_row:g_row + 1, :E]
                + vec[b_row:b_row + 1, :E])

    # ---- self attention + add & norm ----
    qkv = jnp.dot(x.astype(md), sa_wqkv[...],
                  preferred_element_type=jnp.float32)       # (S, 3E)
    attn = attn_core(qkv[:, :E] * inv_scale, qkv[:, E:2 * E], qkv[:, 2 * E:],
                     sa_wo)
    x = add_ln(attn, x, _ROW_LN1_G, _ROW_LN1_B)

    # ---- cross attention + add & norm ----
    if has_cross:
        enc = enc_ref[0].astype(jnp.float32)                # (Skv, E)
        q_c = jnp.dot(x.astype(md), ca_wq[...],
                      preferred_element_type=jnp.float32)   # (S, E)
        kv = jnp.dot(enc.astype(md), ca_wkv[...],
                     preferred_element_type=jnp.float32)    # (Skv, 2E)
        cattn = attn_core(q_c * inv_scale, kv[:, :E], kv[:, E:], ca_wo)
        x = add_ln(cattn, x, _ROW_LN2_G, _ROW_LN2_B)

    # ---- position-wise feed-forward + add & norm ----
    h1 = jnp.dot(x.astype(md), w1[...],
                 preferred_element_type=jnp.float32) + vec[_ROW_FF_B1:_ROW_FF_B1 + 1, :F]
    h1 = jnp.maximum(h1, 0.0)
    ff = jnp.dot(h1.astype(md), w2[...],
                 preferred_element_type=jnp.float32) + vec[_ROW_FF_B2:_ROW_FF_B2 + 1, :E]
    x = add_ln(ff, x, _ROW_LN3_G, _ROW_LN3_B)

    o_ref[0] = x.astype(o_ref.dtype)


# ------------------------- one-time parameter prep ------------------------- #

def prepare_decoder_params(params, *, num_heads, has_cross,
                           matmul_dtype=jnp.float32):
    """Fuse / cast / pack weights ONCE (hoisted out of the per-call hot path)."""
    E = params["sa_wq"].shape[0]
    F = params["ff_w1"].shape[1]
    md = matmul_dtype

    def cat_cols(*ws):
        return jnp.concatenate(ws, axis=1).astype(md)

    prep = {
        "sa_wqkv": cat_cols(params["sa_wq"], params["sa_wk"], params["sa_wv"]),
        "sa_wo": params["sa_wo"].astype(md),
        "ff_w1": params["ff_w1"].astype(md),
        "ff_w2": params["ff_w2"].astype(md),
    }
    if has_cross:
        prep["ca_wq"] = params["ca_wq"].astype(md)
        prep["ca_wkv"] = cat_cols(params["ca_wk"], params["ca_wv"])
        prep["ca_wo"] = params["ca_wo"].astype(md)

    # Pack all small vectors into one 128-lane-padded f32 array (one input,
    # one double buffer, one DMA descriptor instead of ~10 tiny ones).
    W = ((max(E, F) + 127) // 128) * 128

    def row(v, n):
        v = jnp.reshape(v, (-1,))[:n].astype(jnp.float32)
        return jnp.pad(v, (0, W - n))

    rows = [None] * 8
    rows[_ROW_FF_B1] = row(params["ff_b1"], F)
    rows[_ROW_FF_B2] = row(params["ff_b2"], E)
    rows[_ROW_LN1_G] = row(params["ln1_g"], E)
    rows[_ROW_LN1_B] = row(params["ln1_b"], E)
    rows[_ROW_LN3_G] = row(params["ln3_g"], E)
    rows[_ROW_LN3_B] = row(params["ln3_b"], E)
    if has_cross:
        rows[_ROW_LN2_G] = row(params["ln2_g"], E)
        rows[_ROW_LN2_B] = row(params["ln2_b"], E)
    zero = jnp.zeros((W,), jnp.float32)
    prep["vec"] = jnp.stack([r if r is not None else zero for r in rows], 0)

    prep["meta"] = dict(num_heads=num_heads, has_cross=has_cross,
                        matmul_dtype=md, E=E, F=F)
    return prep


# -------------------------------- wrapper ----------------------------------- #

def _full_spec(shape):
    nd = len(shape)
    return pl.BlockSpec(shape, lambda b, _nd=nd: (0,) * _nd)


def decoder_layer(prepared, x, encoder_outputs=None, *, eps=1e-5):
    meta = prepared["meta"]
    H = meta["num_heads"]
    has_cross = meta["has_cross"]
    md = meta["matmul_dtype"]
    F = meta["F"]
    B, S, E = x.shape
    head_dim = E // H

    act_spec = pl.BlockSpec((1, S, E), lambda b: (b, 0, 0))

    args = [x]
    in_specs = [act_spec]
    if has_cross:
        assert encoder_outputs is not None
        Skv = encoder_outputs.shape[1]
        args.append(encoder_outputs)
        in_specs.append(pl.BlockSpec((1, Skv, E), lambda b: (b, 0, 0)))

    def add(name):
        arr = prepared[name]
        args.append(arr)
        in_specs.append(_full_spec(arr.shape))

    add("sa_wqkv"); add("sa_wo")
    if has_cross:
        add("ca_wq"); add("ca_wkv"); add("ca_wo")
    add("ff_w1"); add("ff_w2"); add("vec")

    kernel = functools.partial(
        _decoder_layer_kernel,
        num_heads=H, head_dim=head_dim, ff_dim=F, eps=eps,
        has_cross=has_cross, matmul_dtype=md)

    # grid=(B,) parallel: B=2 feeds both v7x TensorCores; weight blocks have
    # constant index_maps so they are not re-fetched across grid steps.
    # TODO(synk): at realistic S add an S-tile axis and K/F-tile the weights.
    return pl.pallas_call(
        kernel,
        out_shape=jax.ShapeDtypeStruct((B, S, E), jnp.float32),
        grid=(B,),
        in_specs=in_specs,
        out_specs=act_spec,
        compiler_params=pltpu.CompilerParams(
            dimension_semantics=("parallel",),
            vmem_limit_bytes=32 * 1024 * 1024),
    )(*args)


# ---------------------------- pure-JAX reference ---------------------------- #

def _ref_mha(x, kv, wq, wk, wv, wo, H):
    B, S, E = x.shape
    Dh = E // H
    q = (x @ wq).reshape(B, S, H, Dh).transpose(0, 2, 1, 3)
    k = (kv @ wk).reshape(B, -1, H, Dh).transpose(0, 2, 1, 3)
    v = (kv @ wv).reshape(B, -1, H, Dh).transpose(0, 2, 1, 3)
    s = jnp.einsum("bhqd,bhkd->bhqk", q, k) / jnp.sqrt(jnp.float32(Dh))
    p = jax.nn.softmax(s, axis=-1)
    a = jnp.einsum("bhqk,bhkd->bhqd", p, v)
    a = a.transpose(0, 2, 1, 3).reshape(B, S, E)
    return a @ wo


def _ref_ln(x, g, b, eps=1e-5):
    mean = jnp.mean(x, axis=-1, keepdims=True)
    var = jnp.mean((x - mean) ** 2, axis=-1, keepdims=True)
    return (x - mean) * lax.rsqrt(var + eps) * g + b


def _ref_decoder(params, x, enc, H):
    a = _ref_mha(x, x, params["sa_wq"], params["sa_wk"], params["sa_wv"],
                 params["sa_wo"], H)
    x = _ref_ln(a + x, params["ln1_g"], params["ln1_b"])
    if enc is not None:
        c = _ref_mha(x, enc, params["ca_wq"], params["ca_wk"], params["ca_wv"],
                     params["ca_wo"], H)
        x = _ref_ln(c + x, params["ln2_g"], params["ln2_b"])
    h = jnp.maximum(x @ params["ff_w1"] + params["ff_b1"], 0.0)
    ff = h @ params["ff_w2"] + params["ff_b2"]
    return _ref_ln(ff + x, params["ln3_g"], params["ln3_b"])


# ----------------------------------- main ----------------------------------- #

if __name__ == "__main__":
    B, S, S_ENC = 2, 8, 16
    E, H, F = 32, 4, 64

    key = jax.random.PRNGKey(0)
    ks = jax.random.split(key, 16)

    def w(k, shape, scale=0.1):
        return (scale * jax.random.normal(k, shape)).astype(jnp.float32)

    params = {
        "sa_wq": w(ks[0], (E, E)), "sa_wk": w(ks[1], (E, E)),
        "sa_wv": w(ks[2], (E, E)), "sa_wo": w(ks[3], (E, E)),
        "ca_wq": w(ks[4], (E, E)), "ca_wk": w(ks[5], (E, E)),
        "ca_wv": w(ks[6], (E, E)), "ca_wo": w(ks[7], (E, E)),
        "ff_w1": w(ks[8], (E, F)), "ff_b1": w(ks[9], (1, F)),
        "ff_w2": w(ks[10], (F, E)), "ff_b2": w(ks[11], (1, E)),
        "ln1_g": jnp.ones((1, E), jnp.float32), "ln1_b": jnp.zeros((1, E), jnp.float32),
        "ln2_g": jnp.ones((1, E), jnp.float32), "ln2_b": jnp.zeros((1, E), jnp.float32),
        "ln3_g": jnp.ones((1, E), jnp.float32), "ln3_b": jnp.zeros((1, E), jnp.float32),
    }

    x = w(ks[12], (B, S, E), scale=1.0)
    enc = w(ks[13], (B, S_ENC, E), scale=1.0)

    # One-time parameter preparation (weight fusion / cast / packing) hoisted
    # out of the per-forward hot path.
    prep_f32 = prepare_decoder_params(params, num_heads=H, has_cross=True)
    prep_f32_nc = prepare_decoder_params(params, num_heads=H, has_cross=False)
    prep_bf16 = prepare_decoder_params(params, num_heads=H, has_cross=True,
                                       matmul_dtype=jnp.bfloat16)

    # f32 matmuls: strict check against the f32 reference.
    out = jax.block_until_ready(decoder_layer(prep_f32, x, enc))
    ref = _ref_decoder(params, x, enc, H)
    assert out.shape == (B, S, E)
    assert jnp.max(jnp.abs(out - ref)) < 1e-4

    # No-encoder path (encoder_outputs=None branch of the reference forward).
    out_nc = jax.block_until_ready(decoder_layer(prep_f32_nc, x, None))
    ref_nc = _ref_decoder(params, x, None, H)
    assert jnp.max(jnp.abs(out_nc - ref_nc)) < 1e-4

    # bf16 MXU-operand path (perf mode): f32 accumulation, looser tolerance.
    out_bf16 = jax.block_until_ready(decoder_layer(prep_bf16, x, enc))
    assert bool(jnp.all(jnp.isfinite(out_bf16)))
    assert jnp.max(jnp.abs(out_bf16 - ref)) < 1e-1

    print("KERNEL_OK")
</pallas_src>

<mosaic_0001>
module attributes {stable_mosaic.version = 11 : i64} {
  func.func @_decoder_layer_kernel(%arg0: i32, %arg1: memref<1x8x32xf32, #tpu.memory_space<vmem>>, %arg2: memref<1x16x32xf32, #tpu.memory_space<vmem>>, %arg3: memref<32x96xf32, #tpu.memory_space<vmem>>, %arg4: memref<32x32xf32, #tpu.memory_space<vmem>>, %arg5: memref<32x32xf32, #tpu.memory_space<vmem>>, %arg6: memref<32x64xf32, #tpu.memory_space<vmem>>, %arg7: memref<32x32xf32, #tpu.memory_space<vmem>>, %arg8: memref<32x64xf32, #tpu.memory_space<vmem>>, %arg9: memref<64x32xf32, #tpu.memory_space<vmem>>, %arg10: memref<8x128xf32, #tpu.memory_space<vmem>>, %arg11: memref<1x8x32xf32, #tpu.memory_space<vmem>>) attributes {dimension_semantics = [#tpu.dimension_semantics<parallel>], iteration_bounds = array<i64: 2>, scalar_prefetch = 0 : i64, scratch_operands = 0 : i64, tpu.core_type = #tpu.core_type<tc>, window_params = [{transform_indices = @transform_0, window_bounds = array<i64: 1, 8, 32>}, {transform_indices = @transform_1, window_bounds = array<i64: 1, 16, 32>}, {pipeline_mode = #tpu.pipeline_mode<synchronous>, transform_indices = @transform_2, window_bounds = array<i64: 32, 96>}, {pipeline_mode = #tpu.pipeline_mode<synchronous>, transform_indices = @transform_3, window_bounds = array<i64: 32, 32>}, {pipeline_mode = #tpu.pipeline_mode<synchronous>, transform_indices = @transform_4, window_bounds = array<i64: 32, 32>}, {pipeline_mode = #tpu.pipeline_mode<synchronous>, transform_indices = @transform_5, window_bounds = array<i64: 32, 64>}, {pipeline_mode = #tpu.pipeline_mode<synchronous>, transform_indices = @transform_6, window_bounds = array<i64: 32, 32>}, {pipeline_mode = #tpu.pipeline_mode<synchronous>, transform_indices = @transform_7, window_bounds = array<i64: 32, 64>}, {pipeline_mode = #tpu.pipeline_mode<synchronous>, transform_indices = @transform_8, window_bounds = array<i64: 64, 32>}, {pipeline_mode = #tpu.pipeline_mode<synchronous>, transform_indices = @transform_9, window_bounds = array<i64: 8, 128>}, {transform_indices = @transform_10, window_bounds = array<i64: 1, 8, 32>}]} {
    %c0 = arith.constant 0 : index
    %c0_0 = arith.constant 0 : index
    %c0_1 = arith.constant 0 : index
    %0 = vector.load %arg1[%c0, %c0_0, %c0_1] : memref<1x8x32xf32, #tpu.memory_space<vmem>>, vector<1x8x32xf32>
    %1 = vector.shape_cast %0 : vector<1x8x32xf32> to vector<8x32xf32>
    %c0_2 = arith.constant 0 : index
    %c0_3 = arith.constant 0 : index
    %2 = vector.load %arg3[%c0_2, %c0_3] : memref<32x96xf32, #tpu.memory_space<vmem>>, vector<32x96xf32>
    %cst = arith.constant dense<0.000000e+00> : vector<8x96xf32>
    %3 = tpu.matmul %1, %2, %cst {dimension_numbers = #tpu.dot_dimension_numbers<[1], [0], [0], [1], [0, 0, 1, 1], [], []>} : vector<8x32xf32>, vector<32x96xf32>, vector<8x96xf32> -> vector<8x96xf32>
    %4 = vector.extract_strided_slice %3 {offsets = [0, 0], sizes = [8, 32], strides = [1, 1]} : vector<8x96xf32> to vector<8x32xf32>
    %cst_4 = arith.constant 0.353553385 : f32
    %5 = vector.broadcast %cst_4 : f32 to vector<8x32xf32>
    %6 = arith.mulf %4, %5 : vector<8x32xf32>
    %7 = vector.extract_strided_slice %3 {offsets = [0, 32], sizes = [8, 32], strides = [1, 1]} : vector<8x96xf32> to vector<8x32xf32>
    %8 = vector.extract_strided_slice %3 {offsets = [0, 64], sizes = [8, 32], strides = [1, 1]} : vector<8x96xf32> to vector<8x32xf32>
    %9 = vector.extract_strided_slice %6 {offsets = [0, 0], sizes = [8, 8], strides = [1, 1]} : vector<8x32xf32> to vector<8x8xf32>
    %10 = vector.extract_strided_slice %7 {offsets = [0, 0], sizes = [8, 8], strides = [1, 1]} : vector<8x32xf32> to vector<8x8xf32>
    "tpu.trace_start"() <{level = 10 : i32, message = "sd,td->st"}> : () -> ()
    %cst_5 = arith.constant dense<0.000000e+00> : vector<8x8xf32>
    %11 = tpu.matmul %9, %10, %cst_5 {dimension_numbers = #tpu.dot_dimension_numbers<[1], [1], [0], [0], [0, 0, 1, 0], [], []>} : vector<8x8xf32>, vector<8x8xf32>, vector<8x8xf32> -> vector<8x8xf32>
    "tpu.trace_stop"() : () -> ()
    %cst_6 = arith.constant dense<0xFF800000> : vector<8xf32>
    %12 = vector.multi_reduction <maximumf>, %11, %cst_6 [1] : vector<8x8xf32> to vector<8xf32>
    %13 = vector.shape_cast %12 : vector<8xf32> to vector<8x1xf32>
    %14 = vector.broadcast %13 : vector<8x1xf32> to vector<8x8xf32>
    %15 = arith.subf %11, %14 : vector<8x8xf32>
    %16 = math.exp %15 : vector<8x8xf32>
    %cst_7 = arith.constant dense<0.000000e+00> : vector<8xf32>
    %17 = vector.multi_reduction <add>, %16, %cst_7 [1] : vector<8x8xf32> to vector<8xf32>
    %18 = vector.shape_cast %17 : vector<8xf32> to vector<8x1xf32>
    %cst_8 = arith.constant 1.000000e+00 : f32
    %19 = vector.broadcast %cst_8 : f32 to vector<8x1xf32>
    %20 = arith.divf %19, %18 : vector<8x1xf32>
    %21 = vector.broadcast %20 : vector<8x1xf32> to vector<8x8xf32>
    %22 = arith.mulf %16, %21 : vector<8x8xf32>
    %23 = vector.extract_strided_slice %8 {offsets = [0, 0], sizes = [8, 8], strides = [1, 1]} : vector<8x32xf32> to vector<8x8xf32>
    "tpu.trace_start"() <{level = 10 : i32, message = "st,td->sd"}> : () -> ()
    %cst_9 = arith.constant dense<0.000000e+00> : vector<8x8xf32>
    %24 = tpu.matmul %22, %23, %cst_9 {dimension_numbers = #tpu.dot_dimension_numbers<[1], [0], [0], [1], [0, 0, 1, 1], [], []>} : vector<8x8xf32>, vector<8x8xf32>, vector<8x8xf32> -> vector<8x8xf32>
    "tpu.trace_stop"() : () -> ()
    %c0_10 = arith.constant 0 : index
    %c0_11 = arith.constant 0 : index
    %25 = vector.load %arg4[%c0_10, %c0_11] : memref<32x32xf32, #tpu.memory_space<vmem>>, vector<8x32xf32>
    "tpu.trace_start"() <{level = 10 : i32, message = "sd,de->se"}> : () -> ()
    %cst_12 = arith.constant dense<0.000000e+00> : vector<8x32xf32>
    %26 = tpu.matmul %24, %25, %cst_12 {dimension_numbers = #tpu.dot_dimension_numbers<[1], [0], [0], [1], [0, 0, 1, 1], [], []>} : vector<8x8xf32>, vector<8x32xf32>, vector<8x32xf32> -> vector<8x32xf32>
    "tpu.trace_stop"() : () -> ()
    %27 = vector.extract_strided_slice %6 {offsets = [0, 8], sizes = [8, 8], strides = [1, 1]} : vector<8x32xf32> to vector<8x8xf32>
    %28 = vector.extract_strided_slice %7 {offsets = [0, 8], sizes = [8, 8], strides = [1, 1]} : vector<8x32xf32> to vector<8x8xf32>
    "tpu.trace_start"() <{level = 10 : i32, message = "sd,td->st"}> : () -> ()
    %cst_13 = arith.constant dense<0.000000e+00> : vector<8x8xf32>
    %29 = tpu.matmul %27, %28, %cst_13 {dimension_numbers = #tpu.dot_dimension_numbers<[1], [1], [0], [0], [0, 0, 1, 0], [], []>} : vector<8x8xf32>, vector<8x8xf32>, vector<8x8xf32> -> vector<8x8xf32>
    "tpu.trace_stop"() : () -> ()
    %cst_14 = arith.constant dense<0xFF800000> : vector<8xf32>
    %30 = vector.multi_reduction <maximumf>, %29, %cst_14 [1] : vector<8x8xf32> to vector<8xf32>
    %31 = vector.shape_cast %30 : vector<8xf32> to vector<8x1xf32>
    %32 = vector.broadcast %31 : vector<8x1xf32> to vector<8x8xf32>
    %33 = arith.subf %29, %32 : vector<8x8xf32>
    %34 = math.exp %33 : vector<8x8xf32>
    %cst_15 = arith.constant dense<0.000000e+00> : vector<8xf32>
    %35 = vector.multi_reduction <add>, %34, %cst_15 [1] : vector<8x8xf32> to vector<8xf32>
    %36 = vector.shape_cast %35 : vector<8xf32> to vector<8x1xf32>
    %cst_16 = arith.constant 1.000000e+00 : f32
    %37 = vector.broadcast %cst_16 : f32 to vector<8x1xf32>
    %38 = arith.divf %37, %36 : vector<8x1xf32>
    %39 = vector.broadcast %38 : vector<8x1xf32> to vector<8x8xf32>
    %40 = arith.mulf %34, %39 : vector<8x8xf32>
    %41 = vector.extract_strided_slice %8 {offsets = [0, 8], sizes = [8, 8], strides = [1, 1]} : vector<8x32xf32> to vector<8x8xf32>
    "tpu.trace_start"() <{level = 10 : i32, message = "st,td->sd"}> : () -> ()
    %cst_17 = arith.constant dense<0.000000e+00> : vector<8x8xf32>
    %42 = tpu.matmul %40, %41, %cst_17 {dimension_numbers = #tpu.dot_dimension_numbers<[1], [0], [0], [1], [0, 0, 1, 1], [], []>} : vector<8x8xf32>, vector<8x8xf32>, vector<8x8xf32> -> vector<8x8xf32>
    "tpu.trace_stop"() : () -> ()
    %c8 = arith.constant 8 : index
    %c0_18 = arith.constant 0 : index
    %43 = vector.load %arg4[%c8, %c0_18] : memref<32x32xf32, #tpu.memory_space<vmem>>, vector<8x32xf32>
    "tpu.trace_start"() <{level = 10 : i32, message = "sd,de->se"}> : () -> ()
    %cst_19 = arith.constant dense<0.000000e+00> : vector<8x32xf32>
    %44 = tpu.matmul %42, %43, %cst_19 {dimension_numbers = #tpu.dot_dimension_numbers<[1], [0], [0], [1], [0, 0, 1, 1], [], []>} : vector<8x8xf32>, vector<8x32xf32>, vector<8x32xf32> -> vector<8x32xf32>
    "tpu.trace_stop"() : () -> ()
    %45 = arith.addf %26, %44 : vector<8x32xf32>
    %46 = vector.extract_strided_slice %6 {offsets = [0, 16], sizes = [8, 8], strides = [1, 1]} : vector<8x32xf32> to vector<8x8xf32>
    %47 = vector.extract_strided_slice %7 {offsets = [0, 16], sizes = [8, 8], strides = [1, 1]} : vector<8x32xf32> to vector<8x8xf32>
    "tpu.trace_start"() <{level = 10 : i32, message = "sd,td->st"}> : () -> ()
    %cst_20 = arith.constant dense<0.000000e+00> : vector<8x8xf32>
    %48 = tpu.matmul %46, %47, %cst_20 {dimension_numbers = #tpu.dot_dimension_numbers<[1], [1], [0], [0], [0, 0, 1, 0], [], []>} : vector<8x8xf32>, vector<8x8xf32>, vector<8x8xf32> -> vector<8x8xf32>
    "tpu.trace_stop"() : () -> ()
    %cst_21 = arith.constant dense<0xFF800000> : vector<8xf32>
    %49 = vector.multi_reduction <maximumf>, %48, %cst_21 [1] : vector<8x8xf32> to vector<8xf32>
    %50 = vector.shape_cast %49 : vector<8xf32> to vector<8x1xf32>
    %51 = vector.broadcast %50 : vector<8x1xf32> to vector<8x8xf32>
    %52 = arith.subf %48, %51 : vector<8x8xf32>
    %53 = math.exp %52 : vector<8x8xf32>
    %cst_22 = arith.constant dense<0.000000e+00> : vector<8xf32>
    %54 = vector.multi_reduction <add>, %53, %cst_22 [1] : vector<8x8xf32> to vector<8xf32>
    %55 = vector.shape_cast %54 : vector<8xf32> to vector<8x1xf32>
    %cst_23 = arith.constant 1.000000e+00 : f32
    %56 = vector.broadcast %cst_23 : f32 to vector<8x1xf32>
    %57 = arith.divf %56, %55 : vector<8x1xf32>
    %58 = vector.broadcast %57 : vector<8x1xf32> to vector<8x8xf32>
    %59 = arith.mulf %53, %58 : vector<8x8xf32>
    %60 = vector.extract_strided_slice %8 {offsets = [0, 16], sizes = [8, 8], strides = [1, 1]} : vector<8x32xf32> to vector<8x8xf32>
    "tpu.trace_start"() <{level = 10 : i32, message = "st,td->sd"}> : () -> ()
    %cst_24 = arith.constant dense<0.000000e+00> : vector<8x8xf32>
    %61 = tpu.matmul %59, %60, %cst_24 {dimension_numbers = #tpu.dot_dimension_numbers<[1], [0], [0], [1], [0, 0, 1, 1], [], []>} : vector<8x8xf32>, vector<8x8xf32>, vector<8x8xf32> -> vector<8x8xf32>
    "tpu.trace_stop"() : () -> ()
    %c16 = arith.constant 16 : index
    %c0_25 = arith.constant 0 : index
    %62 = vector.load %arg4[%c16, %c0_25] : memref<32x32xf32, #tpu.memory_space<vmem>>, vector<8x32xf32>
    "tpu.trace_start"() <{level = 10 : i32, message = "sd,de->se"}> : () -> ()
    %cst_26 = arith.constant dense<0.000000e+00> : vector<8x32xf32>
    %63 = tpu.matmul %61, %62, %cst_26 {dimension_numbers = #tpu.dot_dimension_numbers<[1], [0], [0], [1], [0, 0, 1, 1], [], []>} : vector<8x8xf32>, vector<8x32xf32>, vector<8x32xf32> -> vector<8x32xf32>
    "tpu.trace_stop"() : () -> ()
    %64 = arith.addf %45, %63 : vector<8x32xf32>
    %65 = vector.extract_strided_slice %6 {offsets = [0, 24], sizes = [8, 8], strides = [1, 1]} : vector<8x32xf32> to vector<8x8xf32>
    %66 = vector.extract_strided_slice %7 {offsets = [0, 24], sizes = [8, 8], strides = [1, 1]} : vector<8x32xf32> to vector<8x8xf32>
    "tpu.trace_start"() <{level = 10 : i32, message = "sd,td->st"}> : () -> ()
    %cst_27 = arith.constant dense<0.000000e+00> : vector<8x8xf32>
    %67 = tpu.matmul %65, %66, %cst_27 {dimension_numbers = #tpu.dot_dimension_numbers<[1], [1], [0], [0], [0, 0, 1, 0], [], []>} : vector<8x8xf32>, vector<8x8xf32>, vector<8x8xf32> -> vector<8x8xf32>
    "tpu.trace_stop"() : () -> ()
    %cst_28 = arith.constant dense<0xFF800000> : vector<8xf32>
    %68 = vector.multi_reduction <maximumf>, %67, %cst_28 [1] : vector<8x8xf32> to vector<8xf32>
    %69 = vector.shape_cast %68 : vector<8xf32> to vector<8x1xf32>
    %70 = vector.broadcast %69 : vector<8x1xf32> to vector<8x8xf32>
    %71 = arith.subf %67, %70 : vector<8x8xf32>
    %72 = math.exp %71 : vector<8x8xf32>
    %cst_29 = arith.constant dense<0.000000e+00> : vector<8xf32>
    %73 = vector.multi_reduction <add>, %72, %cst_29 [1] : vector<8x8xf32> to vector<8xf32>
    %74 = vector.shape_cast %73 : vector<8xf32> to vector<8x1xf32>
    %cst_30 = arith.constant 1.000000e+00 : f32
    %75 = vector.broadcast %cst_30 : f32 to vector<8x1xf32>
    %76 = arith.divf %75, %74 : vector<8x1xf32>
    %77 = vector.broadcast %76 : vector<8x1xf32> to vector<8x8xf32>
    %78 = arith.mulf %72, %77 : vector<8x8xf32>
    %79 = vector.extract_strided_slice %8 {offsets = [0, 24], sizes = [8, 8], strides = [1, 1]} : vector<8x32xf32> to vector<8x8xf32>
    "tpu.trace_start"() <{level = 10 : i32, message = "st,td->sd"}> : () -> ()
    %cst_31 = arith.constant dense<0.000000e+00> : vector<8x8xf32>
    %80 = tpu.matmul %78, %79, %cst_31 {dimension_numbers = #tpu.dot_dimension_numbers<[1], [0], [0], [1], [0, 0, 1, 1], [], []>} : vector<8x8xf32>, vector<8x8xf32>, vector<8x8xf32> -> vector<8x8xf32>
    "tpu.trace_stop"() : () -> ()
    %c24 = arith.constant 24 : index
    %c0_32 = arith.constant 0 : index
    %81 = vector.load %arg4[%c24, %c0_32] : memref<32x32xf32, #tpu.memory_space<vmem>>, vector<8x32xf32>
    "tpu.trace_start"() <{level = 10 : i32, message = "sd,de->se"}> : () -> ()
    %cst_33 = arith.constant dense<0.000000e+00> : vector<8x32xf32>
    %82 = tpu.matmul %80, %81, %cst_33 {dimension_numbers = #tpu.dot_dimension_numbers<[1], [0], [0], [1], [0, 0, 1, 1], [], []>} : vector<8x8xf32>, vector<8x32xf32>, vector<8x32xf32> -> vector<8x32xf32>
    "tpu.trace_stop"() : () -> ()
    %83 = arith.addf %64, %82 : vector<8x32xf32>
    %84 = arith.addf %83, %1 : vector<8x32xf32>
    %cst_34 = arith.constant dense<0.000000e+00> : vector<8xf32>
    %85 = vector.multi_reduction <add>, %84, %cst_34 [1] : vector<8x32xf32> to vector<8xf32>
    %86 = vector.shape_cast %85 : vector<8xf32> to vector<8x1xf32>
    %cst_35 = arith.constant 3.200000e+01 : f32
    %87 = vector.broadcast %cst_35 : f32 to vector<8x1xf32>
    %88 = arith.divf %86, %87 : vector<8x1xf32>
    %89 = vector.broadcast %88 : vector<8x1xf32> to vector<8x32xf32>
    %90 = arith.subf %84, %89 : vector<8x32xf32>
    %91 = arith.mulf %90, %90 : vector<8x32xf32>
    %cst_36 = arith.constant dense<0.000000e+00> : vector<8xf32>
    %92 = vector.multi_reduction <add>, %91, %cst_36 [1] : vector<8x32xf32> to vector<8xf32>
    %93 = vector.shape_cast %92 : vector<8xf32> to vector<8x1xf32>
    %cst_37 = arith.constant 3.200000e+01 : f32
    %94 = vector.broadcast %cst_37 : f32 to vector<8x1xf32>
    %95 = arith.divf %93, %94 : vector<8x1xf32>
    %cst_38 = arith.constant 9.99999974E-6 : f32
    %96 = vector.broadcast %cst_38 : f32 to vector<8x1xf32>
    %97 = arith.addf %95, %96 : vector<8x1xf32>
    %98 = math.rsqrt %97 : vector<8x1xf32>
    %99 = vector.broadcast %98 : vector<8x1xf32> to vector<8x32xf32>
    %100 = arith.mulf %90, %99 : vector<8x32xf32>
    %c2 = arith.constant 2 : index
    %c0_39 = arith.constant 0 : index
    %101 = vector.load %arg10[%c2, %c0_39] : memref<8x128xf32, #tpu.memory_space<vmem>>, vector<1x32xf32>
    %102 = vector.broadcast %101 : vector<1x32xf32> to vector<8x32xf32>
    %103 = arith.mulf %100, %102 : vector<8x32xf32>
    %c3 = arith.constant 3 : index
    %c0_40 = arith.constant 0 : index
    %104 = vector.load %arg10[%c3, %c0_40] : memref<8x128xf32, #tpu.memory_space<vmem>>, vector<1x32xf32>
    %105 = vector.broadcast %104 : vector<1x32xf32> to vector<8x32xf32>
    %106 = arith.addf %103, %105 : vector<8x32xf32>
    %c0_41 = arith.constant 0 : index
    %c0_42 = arith.constant 0 : index
    %c0_43 = arith.constant 0 : index
    %107 = vector.load %arg2[%c0_41, %c0_42, %c0_43] : memref<1x16x32xf32, #tpu.memory_space<vmem>>, vector<1x16x32xf32>
    %108 = vector.shape_cast %107 : vector<1x16x32xf32> to vector<16x32xf32>
    %c0_44 = arith.constant 0 : index
    %c0_45 = arith.constant 0 : index
    %109 = vector.load %arg5[%c0_44, %c0_45] : memref<32x32xf32, #tpu.memory_space<vmem>>, vector<32x32xf32>
    %cst_46 = arith.constant dense<0.000000e+00> : vector<8x32xf32>
    %110 = tpu.matmul %106, %109, %cst_46 {dimension_numbers = #tpu.dot_dimension_numbers<[1], [0], [0], [1], [0, 0, 1, 1], [], []>} : vector<8x32xf32>, vector<32x32xf32>, vector<8x32xf32> -> vector<8x32xf32>
    %c0_47 = arith.constant 0 : index
    %c0_48 = arith.constant 0 : index
    %111 = vector.load %arg6[%c0_47, %c0_48] : memref<32x64xf32, #tpu.memory_space<vmem>>, vector<32x64xf32>
    %cst_49 = arith.constant dense<0.000000e+00> : vector<16x64xf32>
    %112 = tpu.matmul %108, %111, %cst_49 {dimension_numbers = #tpu.dot_dimension_numbers<[1], [0], [0], [1], [0, 0, 1, 1], [], []>} : vector<16x32xf32>, vector<32x64xf32>, vector<16x64xf32> -> vector<16x64xf32>
    %cst_50 = arith.constant 0.353553385 : f32
    %113 = vector.broadcast %cst_50 : f32 to vector<8x32xf32>
    %114 = arith.mulf %110, %113 : vector<8x32xf32>
    %115 = vector.extract_strided_slice %112 {offsets = [0, 0], sizes = [16, 32], strides = [1, 1]} : vector<16x64xf32> to vector<16x32xf32>
    %116 = vector.extract_strided_slice %112 {offsets = [0, 32], sizes = [16, 32], strides = [1, 1]} : vector<16x64xf32> to vector<16x32xf32>
    %117 = vector.extract_strided_slice %114 {offsets = [0, 0], sizes = [8, 8], strides = [1, 1]} : vector<8x32xf32> to vector<8x8xf32>
    %118 = vector.extract_strided_slice %115 {offsets = [0, 0], sizes = [16, 8], strides = [1, 1]} : vector<16x32xf32> to vector<16x8xf32>
    "tpu.trace_start"() <{level = 10 : i32, message = "sd,td->st"}> : () -> ()
    %cst_51 = arith.constant dense<0.000000e+00> : vector<8x16xf32>
    %119 = tpu.matmul %117, %118, %cst_51 {dimension_numbers = #tpu.dot_dimension_numbers<[1], [1], [0], [0], [0, 0, 1, 0], [], []>} : vector<8x8xf32>, vector<16x8xf32>, vector<8x16xf32> -> vector<8x16xf32>
    "tpu.trace_stop"() : () -> ()
    %cst_52 = arith.constant dense<0xFF800000> : vector<8xf32>
    %120 = vector.multi_reduction <maximumf>, %119, %cst_52 [1] : vector<8x16xf32> to vector<8xf32>
    %121 = vector.shape_cast %120 : vector<8xf32> to vector<8x1xf32>
    %122 = vector.broadcast %121 : vector<8x1xf32> to vector<8x16xf32>
    %123 = arith.subf %119, %122 : vector<8x16xf32>
    %124 = math.exp %123 : vector<8x16xf32>
    %cst_53 = arith.constant dense<0.000000e+00> : vector<8xf32>
    %125 = vector.multi_reduction <add>, %124, %cst_53 [1] : vector<8x16xf32> to vector<8xf32>
    %126 = vector.shape_cast %125 : vector<8xf32> to vector<8x1xf32>
    %cst_54 = arith.constant 1.000000e+00 : f32
    %127 = vector.broadcast %cst_54 : f32 to vector<8x1xf32>
    %128 = arith.divf %127, %126 : vector<8x1xf32>
    %129 = vector.broadcast %128 : vector<8x1xf32> to vector<8x16xf32>
    %130 = arith.mulf %124, %129 : vector<8x16xf32>
    %131 = vector.extract_strided_slice %116 {offsets = [0, 0], sizes = [16, 8], strides = [1, 1]} : vector<16x32xf32> to vector<16x8xf32>
    "tpu.trace_start"() <{level = 10 : i32, message = "st,td->sd"}> : () -> ()
    %cst_55 = arith.constant dense<0.000000e+00> : vector<8x8xf32>
    %132 = tpu.matmul %130, %131, %cst_55 {dimension_numbers = #tpu.dot_dimension_numbers<[1], [0], [0], [1], [0, 0, 1, 1], [], []>} : vector<8x16xf32>, vector<16x8xf32>, vector<8x8xf32> -> vector<8x8xf32>
    "tpu.trace_stop"() : () -> ()
    %c0_56 = arith.constant 0 : index
    %c0_57 = arith.constant 0 : index
    %133 = vector.load %arg7[%c0_56, %c0_57] : memref<32x32xf32, #tpu.memory_space<vmem>>, vector<8x32xf32>
    "tpu.trace_start"() <{level = 10 : i32, message = "sd,de->se"}> : () -> ()
    %cst_58 = arith.constant dense<0.000000e+00> : vector<8x32xf32>
    %134 = tpu.matmul %132, %133, %cst_58 {dimension_numbers = #tpu.dot_dimension_numbers<[1], [0], [0], [1], [0, 0, 1, 1], [], []>} : vector<8x8xf32>, vector<8x32xf32>, vector<8x32xf32> -> vector<8x32xf32>
    "tpu.trace_stop"() : () -> ()
    %135 = vector.extract_strided_slice %114 {offsets = [0, 8], sizes = [8, 8], strides = [1, 1]} : vector<8x32xf32> to vector<8x8xf32>
    %136 = vector.extract_strided_slice %115 {offsets = [0, 8], sizes = [16, 8], strides = [1, 1]} : vector<16x32xf32> to vector<16x8xf32>
    "tpu.trace_start"() <{level = 10 : i32, message = "sd,td->st"}> : () -> ()
    %cst_59 = arith.constant dense<0.000000e+00> : vector<8x16xf32>
    %137 = tpu.matmul %135, %136, %cst_59 {dimension_numbers = #tpu.dot_dimension_numbers<[1], [1], [0], [0], [0, 0, 1, 0], [], []>} : vector<8x8xf32>, vector<16x8xf32>, vector<8x16xf32> -> vector<8x16xf32>
    "tpu.trace_stop"() : () -> ()
    %cst_60 = arith.constant dense<0xFF800000> : vector<8xf32>
    %138 = vector.multi_reduction <maximumf>, %137, %cst_60 [1] : vector<8x16xf32> to vector<8xf32>
    %139 = vector.shape_cast %138 : vector<8xf32> to vector<8x1xf32>
    %140 = vector.broadcast %139 : vector<8x1xf32> to vector<8x16xf32>
    %141 = arith.subf %137, %140 : vector<8x16xf32>
    %142 = math.exp %141 : vector<8x16xf32>
    %cst_61 = arith.constant dense<0.000000e+00> : vector<8xf32>
    %143 = vector.multi_reduction <add>, %142, %cst_61 [1] : vector<8x16xf32> to vector<8xf32>
    %144 = vector.shape_cast %143 : vector<8xf32> to vector<8x1xf32>
    %cst_62 = arith.constant 1.000000e+00 : f32
    %145 = vector.broadcast %cst_62 : f32 to vector<8x1xf32>
    %146 = arith.divf %145, %144 : vector<8x1xf32>
    %147 = vector.broadcast %146 : vector<8x1xf32> to vector<8x16xf32>
    %148 = arith.mulf %142, %147 : vector<8x16xf32>
    %149 = vector.extract_strided_slice %116 {offsets = [0, 8], sizes = [16, 8], strides = [1, 1]} : vector<16x32xf32> to vector<16x8xf32>
    "tpu.trace_start"() <{level = 10 : i32, message = "st,td->sd"}> : () -> ()
    %cst_63 = arith.constant dense<0.000000e+00> : vector<8x8xf32>
    %150 = tpu.matmul %148, %149, %cst_63 {dimension_numbers = #tpu.dot_dimension_numbers<[1], [0], [0], [1], [0, 0, 1, 1], [], []>} : vector<8x16xf32>, vector<16x8xf32>, vector<8x8xf32> -> vector<8x8xf32>
    "tpu.trace_stop"() : () -> ()
    %c8_64 = arith.constant 8 : index
    %c0_65 = arith.constant 0 : index
    %151 = vector.load %arg7[%c8_64, %c0_65] : memref<32x32xf32, #tpu.memory_space<vmem>>, vector<8x32xf32>
    "tpu.trace_start"() <{level = 10 : i32, message = "sd,de->se"}> : () -> ()
    %cst_66 = arith.constant dense<0.000000e+00> : vector<8x32xf32>
    %152 = tpu.matmul %150, %151, %cst_66 {dimension_numbers = #tpu.dot_dimension_numbers<[1], [0], [0], [1], [0, 0, 1, 1], [], []>} : vector<8x8xf32>, vector<8x32xf32>, vector<8x32xf32> -> vector<8x32xf32>
    "tpu.trace_stop"() : () -> ()
    %153 = arith.addf %134, %152 : vector<8x32xf32>
    %154 = vector.extract_strided_slice %114 {offsets = [0, 16], sizes = [8, 8], strides = [1, 1]} : vector<8x32xf32> to vector<8x8xf32>
    %155 = vector.extract_strided_slice %115 {offsets = [0, 16], sizes = [16, 8], strides = [1, 1]} : vector<16x32xf32> to vector<16x8xf32>
    "tpu.trace_start"() <{level = 10 : i32, message = "sd,td->st"}> : () -> ()
    %cst_67 = arith.constant dense<0.000000e+00> : vector<8x16xf32>
    %156 = tpu.matmul %154, %155, %cst_67 {dimension_numbers = #tpu.dot_dimension_numbers<[1], [1], [0], [0], [0, 0, 1, 0], [], []>} : vector<8x8xf32>, vector<16x8xf32>, vector<8x16xf32> -> vector<8x16xf32>
    "tpu.trace_stop"() : () -> ()
    %cst_68 = arith.constant dense<0xFF800000> : vector<8xf32>
    %157 = vector.multi_reduction <maximumf>, %156, %cst_68 [1] : vector<8x16xf32> to vector<8xf32>
    %158 = vector.shape_cast %157 : vector<8xf32> to vector<8x1xf32>
    %159 = vector.broadcast %158 : vector<8x1xf32> to vector<8x16xf32>
    %160 = arith.subf %156, %159 : vector<8x16xf32>
    %161 = math.exp %160 : vector<8x16xf32>
    %cst_69 = arith.constant dense<0.000000e+00> : vector<8xf32>
    %162 = vector.multi_reduction <add>, %161, %cst_69 [1] : vector<8x16xf32> to vector<8xf32>
    %163 = vector.shape_cast %162 : vector<8xf32> to vector<8x1xf32>
    %cst_70 = arith.constant 1.000000e+00 : f32
    %164 = vector.broadcast %cst_70 : f32 to vector<8x1xf32>
    %165 = arith.divf %164, %163 : vector<8x1xf32>
    %166 = vector.broadcast %165 : vector<8x1xf32> to vector<8x16xf32>
    %167 = arith.mulf %161, %166 : vector<8x16xf32>
    %168 = vector.extract_strided_slice %116 {offsets = [0, 16], sizes = [16, 8], strides = [1, 1]} : vector<16x32xf32> to vector<16x8xf32>
    "tpu.trace_start"() <{level = 10 : i32, message = "st,td->sd"}> : () -> ()
    %cst_71 = arith.constant dense<0.000000e+00> : vector<8x8xf32>
    %169 = tpu.matmul %167, %168, %cst_71 {dimension_numbers = #tpu.dot_dimension_numbers<[1], [0], [0], [1], [0, 0, 1, 1], [], []>} : vector<8x16xf32>, vector<16x8xf32>, vector<8x8xf32> -> vector<8x8xf32>
    "tpu.trace_stop"() : () -> ()
    %c16_72 = arith.constant 16 : index
    %c0_73 = arith.constant 0 : index
    %170 = vector.load %arg7[%c16_72, %c0_73] : memref<32x32xf32, #tpu.memory_space<vmem>>, vector<8x32xf32>
    "tpu.trace_start"() <{level = 10 : i32, message = "sd,de->se"}> : () -> ()
    %cst_74 = arith.constant dense<0.000000e+00> : vector<8x32xf32>
    %171 = tpu.matmul %169, %170, %cst_74 {dimension_numbers = #tpu.dot_dimension_numbers<[1], [0], [0], [1], [0, 0, 1, 1], [], []>} : vector<8x8xf32>, vector<8x32xf32>, vector<8x32xf32> -> vector<8x32xf32>
    "tpu.trace_stop"() : () -> ()
    %172 = arith.addf %153, %171 : vector<8x32xf32>
    %173 = vector.extract_strided_slice %114 {offsets = [0, 24], sizes = [8, 8], strides = [1, 1]} : vector<8x32xf32> to vector<8x8xf32>
    %174 = vector.extract_strided_slice %115 {offsets = [0, 24], sizes = [16, 8], strides = [1, 1]} : vector<16x32xf32> to vector<16x8xf32>
    "tpu.trace_start"() <{level = 10 : i32, message = "sd,td->st"}> : () -> ()
    %cst_75 = arith.constant dense<0.000000e+00> : vector<8x16xf32>
    %175 = tpu.matmul %173, %174, %cst_75 {dimension_numbers = #tpu.dot_dimension_numbers<[1], [1], [0], [0], [0, 0, 1, 0], [], []>} : vector<8x8xf32>, vector<16x8xf32>, vector<8x16xf32> -> vector<8x16xf32>
    "tpu.trace_stop"() : () -> ()
    %cst_76 = arith.constant dense<0xFF800000> : vector<8xf32>
    %176 = vector.multi_reduction <maximumf>, %175, %cst_76 [1] : vector<8x16xf32> to vector<8xf32>
    %177 = vector.shape_cast %176 : vector<8xf32> to vector<8x1xf32>
    %178 = vector.broadcast %177 : vector<8x1xf32> to vector<8x16xf32>
    %179 = arith.subf %175, %178 : vector<8x16xf32>
    %180 = math.exp %179 : vector<8x16xf32>
    %cst_77 = arith.constant dense<0.000000e+00> : vector<8xf32>
    %181 = vector.multi_reduction <add>, %180, %cst_77 [1] : vector<8x16xf32> to vector<8xf32>
    %182 = vector.shape_cast %181 : vector<8xf32> to vector<8x1xf32>
    %cst_78 = arith.constant 1.000000e+00 : f32
    %183 = vector.broadcast %cst_78 : f32 to vector<8x1xf32>
    %184 = arith.divf %183, %182 : vector<8x1xf32>
    %185 = vector.broadcast %184 : vector<8x1xf32> to vector<8x16xf32>
    %186 = arith.mulf %180, %185 : vector<8x16xf32>
    %187 = vector.extract_strided_slice %116 {offsets = [0, 24], sizes = [16, 8], strides = [1, 1]} : vector<16x32xf32> to vector<16x8xf32>
    "tpu.trace_start"() <{level = 10 : i32, message = "st,td->sd"}> : () -> ()
    %cst_79 = arith.constant dense<0.000000e+00> : vector<8x8xf32>
    %188 = tpu.matmul %186, %187, %cst_79 {dimension_numbers = #tpu.dot_dimension_numbers<[1], [0], [0], [1], [0, 0, 1, 1], [], []>} : vector<8x16xf32>, vector<16x8xf32>, vector<8x8xf32> -> vector<8x8xf32>
    "tpu.trace_stop"() : () -> ()
    %c24_80 = arith.constant 24 : index
    %c0_81 = arith.constant 0 : index
    %189 = vector.load %arg7[%c24_80, %c0_81] : memref<32x32xf32, #tpu.memory_space<vmem>>, vector<8x32xf32>
    "tpu.trace_start"() <{level = 10 : i32, message = "sd,de->se"}> : () -> ()
    %cst_82 = arith.constant dense<0.000000e+00> : vector<8x32xf32>
    %190 = tpu.matmul %188, %189, %cst_82 {dimension_numbers = #tpu.dot_dimension_numbers<[1], [0], [0], [1], [0, 0, 1, 1], [], []>} : vector<8x8xf32>, vector<8x32xf32>, vector<8x32xf32> -> vector<8x32xf32>
    "tpu.trace_stop"() : () -> ()
    %191 = arith.addf %172, %190 : vector<8x32xf32>
    %192 = arith.addf %191, %106 : vector<8x32xf32>
    %cst_83 = arith.constant dense<0.000000e+00> : vector<8xf32>
    %193 = vector.multi_reduction <add>, %192, %cst_83 [1] : vector<8x32xf32> to vector<8xf32>
    %194 = vector.shape_cast %193 : vector<8xf32> to vector<8x1xf32>
    %cst_84 = arith.constant 3.200000e+01 : f32
    %195 = vector.broadcast %cst_84 : f32 to vector<8x1xf32>
    %196 = arith.divf %194, %195 : vector<8x1xf32>
    %197 = vector.broadcast %196 : vector<8x1xf32> to vector<8x32xf32>
    %198 = arith.subf %192, %197 : vector<8x32xf32>
    %199 = arith.mulf %198, %198 : vector<8x32xf32>
    %cst_85 = arith.constant dense<0.000000e+00> : vector<8xf32>
    %200 = vector.multi_reduction <add>, %199, %cst_85 [1] : vector<8x32xf32> to vector<8xf32>
    %201 = vector.shape_cast %200 : vector<8xf32> to vector<8x1xf32>
    %cst_86 = arith.constant 3.200000e+01 : f32
    %202 = vector.broadcast %cst_86 : f32 to vector<8x1xf32>
    %203 = arith.divf %201, %202 : vector<8x1xf32>
    %cst_87 = arith.constant 9.99999974E-6 : f32
    %204 = vector.broadcast %cst_87 : f32 to vector<8x1xf32>
    %205 = arith.addf %203, %204 : vector<8x1xf32>
    %206 = math.rsqrt %205 : vector<8x1xf32>
    %207 = vector.broadcast %206 : vector<8x1xf32> to vector<8x32xf32>
    %208 = arith.mulf %198, %207 : vector<8x32xf32>
    %c6 = arith.constant 6 : index
    %c0_88 = arith.constant 0 : index
    %209 = vector.load %arg10[%c6, %c0_88] : memref<8x128xf32, #tpu.memory_space<vmem>>, vector<1x32xf32>
    %210 = vector.broadcast %209 : vector<1x32xf32> to vector<8x32xf32>
    %211 = arith.mulf %208, %210 : vector<8x32xf32>
    %c7 = arith.constant 7 : index
    %c0_89 = arith.constant 0 : index
    %212 = vector.load %arg10[%c7, %c0_89] : memref<8x128xf32, #tpu.memory_space<vmem>>, vector<1x32xf32>
    %213 = vector.broadcast %212 : vector<1x32xf32> to vector<8x32xf32>
    %214 = arith.addf %211, %213 : vector<8x32xf32>
    %c0_90 = arith.constant 0 : index
    %c0_91 = arith.constant 0 : index
    %215 = vector.load %arg8[%c0_90, %c0_91] : memref<32x64xf32, #tpu.memory_space<vmem>>, vector<32x64xf32>
    %cst_92 = arith.constant dense<0.000000e+00> : vector<8x64xf32>
    %216 = tpu.matmul %214, %215, %cst_92 {dimension_numbers = #tpu.dot_dimension_numbers<[1], [0], [0], [1], [0, 0, 1, 1], [], []>} : vector<8x32xf32>, vector<32x64xf32>, vector<8x64xf32> -> vector<8x64xf32>
    %c0_93 = arith.constant 0 : index
    %c0_94 = arith.constant 0 : index
    %217 = vector.load %arg10[%c0_93, %c0_94] : memref<8x128xf32, #tpu.memory_space<vmem>>, vector<1x64xf32>
    %218 = vector.broadcast %217 : vector<1x64xf32> to vector<8x64xf32>
    %219 = arith.addf %216, %218 : vector<8x64xf32>
    %cst_95 = arith.constant 0.000000e+00 : f32
    %220 = vector.broadcast %cst_95 : f32 to vector<8x64xf32>
    %221 = arith.maximumf %219, %220 : vector<8x64xf32>
    %c0_96 = arith.constant 0 : index
    %c0_97 = arith.constant 0 : index
    %222 = vector.load %arg9[%c0_96, %c0_97] : memref<64x32xf32, #tpu.memory_space<vmem>>, vector<64x32xf32>
    %cst_98 = arith.constant dense<0.000000e+00> : vector<8x32xf32>
    %223 = tpu.matmul %221, %222, %cst_98 {dimension_numbers = #tpu.dot_dimension_numbers<[1], [0], [0], [1], [0, 0, 1, 1], [], []>} : vector<8x64xf32>, vector<64x32xf32>, vector<8x32xf32> -> vector<8x32xf32>
    %c1 = arith.constant 1 : index
    %c0_99 = arith.constant 0 : index
    %224 = vector.load %arg10[%c1, %c0_99] : memref<8x128xf32, #tpu.memory_space<vmem>>, vector<1x32xf32>
    %225 = vector.broadcast %224 : vector<1x32xf32> to vector<8x32xf32>
    %226 = arith.addf %223, %225 : vector<8x32xf32>
    %227 = arith.addf %226, %214 : vector<8x32xf32>
    %cst_100 = arith.constant dense<0.000000e+00> : vector<8xf32>
    %228 = vector.multi_reduction <add>, %227, %cst_100 [1] : vector<8x32xf32> to vector<8xf32>
    %229 = vector.shape_cast %228 : vector<8xf32> to vector<8x1xf32>
    %cst_101 = arith.constant 3.200000e+01 : f32
    %230 = vector.broadcast %cst_101 : f32 to vector<8x1xf32>
    %231 = arith.divf %229, %230 : vector<8x1xf32>
    %232 = vector.broadcast %231 : vector<8x1xf32> to vector<8x32xf32>
    %233 = arith.subf %227, %232 : vector<8x32xf32>
    %234 = arith.mulf %233, %233 : vector<8x32xf32>
    %cst_102 = arith.constant dense<0.000000e+00> : vector<8xf32>
    %235 = vector.multi_reduction <add>, %234, %cst_102 [1] : vector<8x32xf32> to vector<8xf32>
    %236 = vector.shape_cast %235 : vector<8xf32> to vector<8x1xf32>
    %cst_103 = arith.constant 3.200000e+01 : f32
    %237 = vector.broadcast %cst_103 : f32 to vector<8x1xf32>
    %238 = arith.divf %236, %237 : vector<8x1xf32>
    %cst_104 = arith.constant 9.99999974E-6 : f32
    %239 = vector.broadcast %cst_104 : f32 to vector<8x1xf32>
    %240 = arith.addf %238, %239 : vector<8x1xf32>
    %241 = math.rsqrt %240 : vector<8x1xf32>
    %242 = vector.broadcast %241 : vector<8x1xf32> to vector<8x32xf32>
    %243 = arith.mulf %233, %242 : vector<8x32xf32>
    %c4 = arith.constant 4 : index
    %c0_105 = arith.constant 0 : index
    %244 = vector.load %arg10[%c4, %c0_105] : memref<8x128xf32, #tpu.memory_space<vmem>>, vector<1x32xf32>
    %245 = vector.broadcast %244 : vector<1x32xf32> to vector<8x32xf32>
    %246 = arith.mulf %243, %245 : vector<8x32xf32>
    %c5 = arith.constant 5 : index
    %c0_106 = arith.constant 0 : index
    %247 = vector.load %arg10[%c5, %c0_106] : memref<8x128xf32, #tpu.memory_space<vmem>>, vector<1x32xf32>
    %248 = vector.broadcast %247 : vector<1x32xf32> to vector<8x32xf32>
    %249 = arith.addf %246, %248 : vector<8x32xf32>
    %c0_107 = arith.constant 0 : index
    %c0_108 = arith.constant 0 : index
    %c0_109 = arith.constant 0 : index
    %250 = vector.load %arg11[%c0_107, %c0_108, %c0_109] : memref<1x8x32xf32, #tpu.memory_space<vmem>>, vector<1x8x32xf32>
    %251 = vector.shape_cast %250 : vector<1x8x32xf32> to vector<8x32xf32>
    %252 = vector.shape_cast %249 : vector<8x32xf32> to vector<1x8x32xf32>
    tpu.vector_store %arg11[%c0_107, %c0_108, %c0_109], %252 {strides = array<i32>} : memref<1x8x32xf32, #tpu.memory_space<vmem>>, vector<1x8x32xf32>,
    return
  }
  func.func @transform_0(%arg0: i32) -> (i32, i32, i32) {
    %c0_i32 = arith.constant 0 : i32
    %c0_i32_0 = arith.constant 0 : i32
    %c0_i32_1 = arith.constant 0 : i32
    return %arg0, %c0_i32, %c0_i32_0 : i32, i32, i32
  }
  func.func @transform_1(%arg0: i32) -> (i32, i32, i32) {
    %c0_i32 = arith.constant 0 : i32
    %c0_i32_0 = arith.constant 0 : i32
    %c0_i32_1 = arith.constant 0 : i32
    return %arg0, %c0_i32, %c0_i32_0 : i32, i32, i32
  }
  func.func @transform_2(%arg0: i32) -> (i32, i32) {
    %c0_i32 = arith.constant 0 : i32
    %c0_i32_0 = arith.constant 0 : i32
    %c0_i32_1 = arith.constant 0 : i32
    return %c0_i32, %c0_i32_0 : i32, i32
  }
  func.func @transform_3(%arg0: i32) -> (i32, i32) {
    %c0_i32 = arith.constant 0 : i32
    %c0_i32_0 = arith.constant 0 : i32
    %c0_i32_1 = arith.constant 0 : i32
    return %c0_i32, %c0_i32_0 : i32, i32
  }
  func.func @transform_4(%arg0: i32) -> (i32, i32) {
    %c0_i32 = arith.constant 0 : i32
    %c0_i32_0 = arith.constant 0 : i32
    %c0_i32_1 = arith.constant 0 : i32
    return %c0_i32, %c0_i32_0 : i32, i32
  }
  func.func @transform_5(%arg0: i32) -> (i32, i32) {
    %c0_i32 = arith.constant 0 : i32
    %c0_i32_0 = arith.constant 0 : i32
    %c0_i32_1 = arith.constant 0 : i32
    return %c0_i32, %c0_i32_0 : i32, i32
  }
  func.func @transform_6(%arg0: i32) -> (i32, i32) {
    %c0_i32 = arith.constant 0 : i32
    %c0_i32_0 = arith.constant 0 : i32
    %c0_i32_1 = arith.constant 0 : i32
    return %c0_i32, %c0_i32_0 : i32, i32
  }
  func.func @transform_7(%arg0: i32) -> (i32, i32) {
    %c0_i32 = arith.constant 0 : i32
    %c0_i32_0 = arith.constant 0 : i32
    %c0_i32_1 = arith.constant 0 : i32
    return %c0_i32, %c0_i32_0 : i32, i32
  }
  func.func @transform_8(%arg0: i32) -> (i32, i32) {
    %c0_i32 = arith.constant 0 : i32
    %c0_i32_0 = arith.constant 0 : i32
    %c0_i32_1 = arith.constant 0 : i32
    return %c0_i32, %c0_i32_0 : i32, i32
  }
  func.func @transform_9(%arg0: i32) -> (i32, i32) {
    %c0_i32 = arith.constant 0 : i32
    %c0_i32_0 = arith.constant 0 : i32
    %c0_i32_1 = arith.constant 0 : i32
    return %c0_i32, %c0_i32_0 : i32, i32
  }
  func.func @transform_10(%arg0: i32) -> (i32, i32, i32) {
    %c0_i32 = arith.constant 0 : i32
    %c0_i32_0 = arith.constant 0 : i32
    %c0_i32_1 = arith.constant 0 : i32
    return %arg0, %c0_i32, %c0_i32_0 : i32, i32, i32
  }
}

</mosaic_0001>

<bundles_post_ra>
// kernel: tpu_custom_call.1
= control target key start
LH: loop header
LB: loop body
LE: loop exit
PB: predicated region body
PF: predicated region fallthrough
CT: control target
= control target key end

     0   :  { %s4512_s0 = inlined_call_operand.hbm [shape: f32[2,8,32], index: 0, kind: input, shape index: {}]   ;;  %s4513_s1 = inlined_call_operand.vmem [shape: f32[2,16,32], index: 1, kind: input, shape index: {}]   ;;  %s4514_s2 = inlined_call_operand.vmem [shape: f32[32,96], index: 2, kind: input, shape index: {}]   ;;  %s4515_s3 = inlined_call_operand.vmem [shape: f32[32,32], index: 3, kind: input, shape index: {}]   ;;  %s4516_s4 = inlined_call_operand.hbm [shape: f32[32,32], index: 4, kind: input, shape index: {}]   ;;  %s4517_s5 = inlined_call_operand.hbm [shape: f32[32,64], index: 5, kind: input, shape index: {}]   ;;  %s4518_s6 = inlined_call_operand.hbm [shape: f32[32,32], index: 6, kind: input, shape index: {}]   ;;  %s4519_s7 = inlined_call_operand.hbm [shape: f32[32,64], index: 7, kind: input, shape index: {}]   ;;  %s4520_s8 = inlined_call_operand.vmem [shape: f32[64,32], index: 8, kind: input, shape index: {}]   ;;  %s4521_s9 = inlined_call_operand.vmem [shape: f32[8,128], index: 9, kind: input, shape index: {}]   ;;  %s4522_s10 = inlined_call_operand.hbm [shape: f32[2,8,32], index: 10, kind: output, shape index: {}]  }
   0x1   :  { %4528 = sst [smem:[#allocation16_spill]] %s4516_s4 }
   0x2   :  { %4529 = sst [smem:[#allocation17_spill]] %s4520_s8 }
   0x3   :  { %4530 = sst [smem:[#allocation18_spill]] %s4522_s10 }
   0x4   :  { %15 = vsyncpa [#allocation3], 0 }
   0x5   :  { %17 = vsyncpa [#allocation3 + $0x1], 0 }
   0x6   :  { %18 = vsyncpa [#allocation6], 0 }
   0x7   :  { %19 = vsyncpa [#allocation9], 0 }
   0x8   :  { %20 = vsyncpa [#allocation4], 0 }
   0x9   :  { %22 = vsyncpa [#allocation4 + $0x1], 0  ;;  %s3928_s13 = smov 0   ;;  %s3930_s14 = smov 0  }
   0xa   :  { %s3932_s15 = smov 0   ;;  %s3934_s16 = smov 0  }
   0xb LB: > { %s3851_s17 = smov [#allocation5]   ;;  %s3949_s19 = sadd.s32 4294967295, %s3849_s16   ;;  %s3849_s16 = sphi %s3934_s16, %s4556_s16   ;;  %s3845_s15 = sphi %s3932_s15, %s4555_s15   ;;  %s3841_s14 = sphi %s3930_s14, %s4554_s14   ;;  %s3837_s13 = sphi %s3928_s13, %s4553_s13  }
   0xc   : > { %s297_s18 = sshll.u32 %s3851_s17, 4  ;;  %p3034_p0 = scmp.ge.s32.totalorder %s3849_s16, 1  ;;  %s3954_s18 = int_to_ptr.vmem [resolvable:$true] %s297_s18 }
   0xd   : > { %p4525_p1 = scmp.eq.s32.totalorder %s3949_s19, 0  ;;  %p279_p2 = scmp.lt.s32.totalorder %s3849_s16, 3 }
   0xe   : > { %s3852_s21 = smov [#allocation8]   ;;  %s3853_s24 = smov [#allocation7]  }
   0xf   : > { %p3956_p3 = pnand %p3034_p0, %p279_p2  ;;  %s323_s22 = sshll.u32 %s3852_s21, 4  ;;  %s3969_s22 = int_to_ptr.vmem [resolvable:$true] %s323_s22 }
  0x10   : > { %s310_s25 = sshll.u32 %s3853_s24, 4  ;;  %s4533_s4 = sld [smem:[#allocation16_spill]]  ;;  %s3971_s25 = int_to_ptr.vmem [resolvable:$true] %s310_s25 }
  0x11   : > { %s4531_s20 = scalar_select %p3956_p3, 1, 0 }
  0x12   : > { %p3477_p5 = pneg %p3956_p3 }
  0x14   : > { %p3965_p6 = pnand %p3477_p5, %p4525_p1 }
  0x16   : > { %s3633_s28 = scalar_lea.hbm %s4533_s4, 512  ;;  %p3981_p8 = pneg %p3965_p6 }
  0x17   : > { %p3634_p7 = scmp.ne.s32.totalorder %s4533_s4, %s3633_s28  ;;  %p3640_p11 = scmp.lt.u32.totalorder %s3633_s28, %s4533_s4 }
  0x19   : > { %p3636_p9 = pnand %p3981_p8, %p3634_p7 }
  0x1b   : > { %p3637_p10 = pneg %p3636_p9 }
  0x1d   : > { %p3642_p12 = pnand %p3640_p11, %p3637_p10 }
  0x1f   : > { %3645 = shalt.err (!%p3642_p12)
}
  0x20   : > { %s3646_s21 = scalar_lea.vmem %s3954_s18, 512  ;;  %p3654_p5 = scmp.lt.s32.totalorder %s3954_s18, %s3954_s18 }
  0x21   : > { %p3647_p13 = scmp.ne.s32.totalorder %s3954_s18, %s3646_s21  ;;  %p3655_p4 = scmp.lt.s32.totalorder %s3646_s21, %s3646_s21 }
  0x23   : > { %p3649_p0 = pnand %p3647_p13, %p3981_p8  ;;  %p3656_p7 = por %p3655_p4, %p3654_p5 }
  0x25   : > { %p3650_p2 = pneg %p3649_p0 }
  0x27   : > { %p3657_p9 = pnand %p3656_p7, %p3650_p2 }
  0x29   : > { %3660 = shalt.err (!%p3657_p9)
}
  0x2a   : > { %s3854_s24 = smov 128   ;;  %s3855_s26 = smov 8  }
  0x2b   : > { %3480 = dma.hbm_to_vmem [thread:$0]  (!%p3965_p6), %s4533_s4, 512, %s3954_s18, [#allocation6], %s3854_s24, %s3854_s24, %s3855_s26  }
  0x2c   : > { %s3661_s12 = scalar_lea.hbm %s4518_s6, 512 }
  0x2d   : > { %p3662_p4 = scmp.ne.s32.totalorder %s4518_s6, %s3661_s12  ;;  %p3668_p12 = scmp.lt.u32.totalorder %s3661_s12, %s4518_s6 }
  0x2f   : > { %p3664_p10 = pnand %p3662_p4, %p3981_p8 }
  0x31   : > { %p3665_p11 = pneg %p3664_p10 }
  0x33   : > { %p3670_p13 = pnand %p3668_p12, %p3665_p11 }
  0x35   : > { %3673 = shalt.err (!%p3670_p13)
}
  0x36   : > { %s3674_s18 = scalar_lea.vmem %s3969_s22, 512  ;;  %p3682_p7 = scmp.lt.s32.totalorder %s3969_s22, %s3969_s22 }
  0x37   : > { %p3675_p0 = scmp.ne.s32.totalorder %s3969_s22, %s3674_s18  ;;  %p3683_p9 = scmp.lt.s32.totalorder %s3674_s18, %s3674_s18 }
  0x39   : > { %p3677_p2 = pnand %p3675_p0, %p3981_p8  ;;  %p3684_p4 = por %p3683_p9, %p3682_p7 }
  0x3b   : > { %p3678_p5 = pneg %p3677_p2 }
  0x3d   : > { %p3685_p10 = pnand %p3684_p4, %p3678_p5 }
  0x3f   : > { %3688 = shalt.err (!%p3685_p10)
}
  0x40   : > { %3486 = dma.hbm_to_vmem [thread:$0]  (!%p3965_p6), %s4518_s6, 512, %s3969_s22, [#allocation9], %s3854_s24, %s3854_s24, %s3855_s26  }
  0x41   : > { %s3689_s29 = scalar_lea.hbm %s4517_s5, 512 }
  0x42   : > { %p3690_p11 = scmp.ne.s32.totalorder %s4517_s5, %s3689_s29  ;;  %p3696_p0 = scmp.lt.u32.totalorder %s3689_s29, %s4517_s5 }
  0x44   : > { %p3692_p12 = pnand %p3690_p11, %p3981_p8 }
  0x46   : > { %p3693_p13 = pneg %p3692_p12 }
  0x48   : > { %p3698_p2 = pnand %p3696_p0, %p3693_p13 }
  0x4a   : > { %3701 = shalt.err (!%p3698_p2)
}
  0x4b   : > { %s3702_s22 = scalar_lea.vmem %s3971_s25, 512  ;;  %p3710_p4 = scmp.lt.s32.totalorder %s3971_s25, %s3971_s25 }
  0x4c   : > { %p3703_p5 = scmp.ne.s32.totalorder %s3971_s25, %s3702_s22  ;;  %p3711_p10 = scmp.lt.s32.totalorder %s3702_s22, %s3702_s22 }
  0x4e   : > { %p3705_p7 = pnand %p3703_p5, %p3981_p8  ;;  %p3712_p11 = por %p3711_p10, %p3710_p4 }
  0x50   : > { %p3706_p9 = pneg %p3705_p7 }
  0x52   : > { %p3713_p12 = pnand %p3712_p11, %p3706_p9 }
  0x54   : > { %3716 = shalt.err (!%p3713_p12)
}
  0x55   : > { %3483 = dma.hbm_to_vmem [thread:$0]  (!%p3965_p6), %s4517_s5, 512, %s3971_s25, [#allocation6], %s3854_s24, %s3854_s24, %s3855_s26  }
  0x56   : > { %s3856_s10 = smov [#allocation10]   ;;  %s3717_s30 = scalar_lea.hbm %s4519_s7, 512 }
  0x57   : > { %s336_s27 = sshll.u32 %s3856_s10, 4  ;;  %p3718_p13 = scmp.ne.s32.totalorder %s4519_s7, %s3717_s30  ;;  %s337_s27 = int_to_ptr.vmem [resolvable:$true] %s336_s27 }
  0x58   : > { %p3724_p5 = scmp.lt.u32.totalorder %s3717_s30, %s4519_s7 }
  0x59   : > { %p3720_p0 = pnand %p3718_p13, %p3981_p8 }
  0x5b   : > { %p3721_p2 = pneg %p3720_p0 }
  0x5d   : > { %p3726_p7 = pnand %p3724_p5, %p3721_p2 }
  0x5f   : > { %3729 = shalt.err (!%p3726_p7)
}
  0x60   : > { %s3730_s25 = scalar_lea.vmem %s337_s27, 512  ;;  %p3738_p11 = scmp.lt.s32.totalorder %s337_s27, %s337_s27 }
  0x61   : > { %p3731_p9 = scmp.ne.s32.totalorder %s337_s27, %s3730_s25  ;;  %p3739_p12 = scmp.lt.s32.totalorder %s3730_s25, %s3730_s25 }
  0x63   : > { %p3733_p4 = pnand %p3731_p9, %p3981_p8  ;;  %p3740_p1 = por %p3739_p12, %p3738_p11 }
  0x65   : > { %p3734_p10 = pneg %p3733_p4 }
  0x67   : > { %p3741_p3 = pnand %p3740_p1, %p3734_p10 }
  0x69   : > { %3744 = shalt.err (!%p3741_p3)
}
  0x6a   : > { %3489 = dma.hbm_to_vmem [thread:$0]  (!%p3965_p6), %s4519_s7, 512, %s337_s27, [#allocation9], %s3854_s24, %s3854_s24, %s3855_s26  }
  0x6b   : > { %s3033_s23 = sadd.s32 4294967294, %s3849_s16   ;;  %s4080_s11 = sadd.s32 1, %s3849_s16  }
  0x6c   : > { %s32_s10 = ssub.s32 %s3849_s16, %s4080_s11  ;;  %s35_s28 = sadd.s32 1, %s3845_s15 }
  0x6d   : > { %p33_p1 = scmp.eq.s32.totalorder %s32_s10, 0  ;;  %p42_p3 = scmp.ne.s32.totalorder %s3845_s15, %s3841_s14 }
  0x6e   : > { %p43_p8 = scmp.eq.s32.totalorder %s3849_s16, 0  ;;  %p48_p13 = scmp.ne.s32.totalorder %s3841_s14, %s3837_s13 }
  0x6f   : > { %s4091_s29 = scalar_select %p33_p1, %s3845_s15, %s35_s28  }
  0x70   : > { %p4093_p0 = por %p43_p8, %p42_p3  ;;  %p4536_p2 = scmp.eq.s32.totalorder %s3949_s19, 0 }
  0x71   : > { %p266_p5 = scmp.eq.s32.totalorder %s3949_s19, 1  ;;  %p272_p7 = scmp.eq.s32.totalorder %s3033_s23, 1 }
  0x72   : > { %p4099_p6 = por %p4536_p2, %p48_p13  ;;  %p3502_p9 = scmp.lt.s32.totalorder %s3849_s16, 2 }
  0x73   : > { %s356_s26 = sand.u32 1, %s3845_s15   ;;  %p4106_p4 = por %p266_p5, %p42_p3 }
  0x74   : > { %p4110_p10 = por %p272_p7, %p48_p13  ;;  %s3040_s17 = sshll.u32 %s356_s26, 3 }
  0x75   : > { %s4538_s27 = scalar_select %p4106_p4, 1, 0 }
  0x76   : > { %s4539_s12 = scalar_select %p4110_p10, 1, 0 }
  0x77   : > { %s3041_s21 = sshll.u32 %s3849_s16, 7  ;;  %s360_s8 = scalar_lea.vmem [#allocation2], %s3040_s17 }
  0x78   : > { %s4118_s18 = scalar_lea.hbm %s4512_s0, %s3041_s21  ;;  %s367_s23 = sshll.u32 %s360_s8, 4  ;;  %s4120_s23 = int_to_ptr.vmem [resolvable:$true] %s367_s23 }
  0x79   : > { %p4124_p11 = pnand %p3502_p9, %p4093_p0  ;;  %s357_s28 = scalar_lea.sflag [#allocation3], %s356_s26 }
  0x7a   : > { %s3745_s4 = scalar_lea.hbm %s4118_s18, 128  ;;  %s3750_s22 = scalar_lea.hbm %s4512_s0, 256 }
  0x7b   : > { %p3746_p12 = scmp.ne.s32.totalorder %s4118_s18, %s3745_s4  ;;  %p3747_p1 = pneg %p4124_p11 }
  0x7c   : > { %p3751_p13 = scmp.lt.u32.totalorder %s4118_s18, %s4512_s0  ;;  %p3752_p0 = scmp.lt.u32.totalorder %s3750_s22, %s3745_s4 }
  0x7d   : > { %p3748_p3 = pnand %p3747_p1, %p3746_p12  ;;  %p3754_p5 = scmp.lt.u32.totalorder %s3745_s4, %s4118_s18 }
  0x7e   : > { %p3753_p2 = por %p3752_p0, %p3751_p13 }
  0x7f   : > { %p3749_p8 = pneg %p3748_p3 }
  0x80   : > { %p3755_p7 = por %p3754_p5, %p3753_p2 }
  0x82   : > { %p3756_p9 = pnand %p3755_p7, %p3749_p8 }
  0x84   : > { %3759 = shalt.err (!%p3756_p9)
}
  0x85   : > { %s3760_s26 = scalar_lea.vmem %s4120_s23, 128  ;;  %s3857_s8 = smov [#allocation2]  }
  0x86   : > { %p3761_p12 = scmp.ne.s32.totalorder %s4120_s23, %s3760_s26  ;;  %s3765_s17 = sshll.u32 %s3857_s8, 4  ;;  %s3766_s17 = int_to_ptr.vmem [resolvable:$false] %s3765_s17 }
  0x87   : > { %s3767_s21 = scalar_lea.vmem %s3766_s17, 256  ;;  %p3768_p4 = scmp.lt.s32.totalorder %s4120_s23, %s3766_s17 }
  0x88   : > { %p3763_p3 = pnand %p3761_p12, %p3747_p1  ;;  %p3769_p13 = scmp.lt.s32.totalorder %s3767_s21, %s3760_s26 }
  0x8a   : > { %p3764_p10 = pneg %p3763_p3  ;;  %p3770_p0 = por %p3769_p13, %p3768_p4 }
  0x8c   : > { %p3771_p2 = pnand %p3770_p0, %p3764_p10 }
  0x8e   : > { %3774 = shalt.err (!%p3771_p2)
}
  0x8f   : > { %3493 = dma.hbm_to_vmem [thread:$0]  (!%p4124_p11), %s4118_s18, 128, %s4120_s23, %s357_s28  }
  0x90   : > { %p4541_p8 = scmp.ne.s32.totalorder %s4531_s20, 0 }
  0x91   : > { %s4156_s4 = sand.u32 (!%p4541_p8), 1, %s3841_s14  }
  0x92   : > { %384 = sbr.rel (%p4541_p8) target bundleno = 6782 (0x1a7e), region = 60  ;;  %s3043_s22 = sshll.u32 (!%p4541_p8), %s4156_s4, 3 }
  0x93   : > { %s387_s30 = scalar_lea.sflag (!%p4541_p8), [#allocation3], %s4156_s4  ;;  %s390_s25 = scalar_lea.vmem (!%p4541_p8), [#allocation2], %s3043_s22 }
  0x99   : > { %3820 = dma.done.wait (%p4099_p6), %s387_s30, 128  }
  0x9a   : > { %3822 = vsyncadd (%p4099_p6), %s387_s30, 4294967168  ;;  %p4542_p4 = scmp.eq.s32.totalorder %s3949_s19, 0 }
  0x9c   : > { %3824 = dma.done.wait (%p4542_p4), [#allocation6], 1024   ;;  %p4543_p10 = pmov %p4542_p4 }
  0x9d   : > { %p4544_p11 = pmov %p4542_p4 }
  0x9e   : > { %3826 = vsyncadd (%p4543_p10), [#allocation6], 4294966272 }
  0x9f   : > { %3828 = dma.done.wait (%p4544_p11), [#allocation9], 1024   ;;  %p4545_p1 = pmov %p4542_p4 }
  0xa0   : > { %v3858_v0 = vmov 0.0|0.0   ;;  %vm3859_vm0 = vmmov 0   ;;  %v3860_v1 = vmov 0.0   ;;  %v454_v2 = vld [vmem:[%s4514_s2] sm:$0xff]  ;;  %v455_v3 = vld [vmem:[%s4514_s2 + $0x8] sm:$0xff]  ;;  %v456_v4 = vld [vmem:[%s4514_s2 + $0x10] sm:$0xff] }
  0xa1   : > { %3830 = vsyncadd (%p4545_p1), [#allocation9], 4294966272  ;;  %3391 = vmatprep.subr.bf16.mxu0 %v3858_v0  ;;  %3200 = vmatprep.mubr.msk.f32.mxu0 %vm3859_vm0, %v3860_v1  ;;  %v3392_v5 = vpack.c.bf16 %v455_v3, %v454_v2  ;;  %v457_v6 = vld [vmem:[%s4514_s2 + $0x18] sm:$0xff]  ;;  %v4193_v8 = vld [vmem:[%s390_s25] sm:$0xff]  ;;  %vm458_vm1 = vcmask 261120   ;;  %s3861_s17 = smov 96  }
  0xa2   : > { %3208 = vmatprep.subr.mxu1 %v3860_v1  ;;  %3210 = vmatprep.mubr.msk.f32.mxu1 %vm3859_vm0, %v3860_v1  ;;  %v3395_v7 = vpack.c.bf16 %v457_v6, %v456_v4  ;;  %s3862_s21 = smov 120   ;;  %s3863_s30 = smov 88   ;;  %vm536_vm2 = vcmask 64512   ;;  %v867_v31 = vld [vmem:[%s4515_s3 + $0x8] sm:$0xff]  ;;  %v700_v40 = vld [vmem:[%s4515_s3] sm:$0xff]  ;;  %v1180_v4 = vld [vmem:[%s4515_s3 + $0x10] sm:$0xff] }
  0xa3   : > { %3393 = vmatpush3.bf16.msra.mxu0 %v3392_v5  ;;  %s3864_s25 = smov 56   ;;  %s3865_s20 = smov 64   ;;  %vm4322_vm3 = vmpackc.low %vm536_vm2, %vm536_vm2  ;;  %vm1767_vm4 = vcmask 130048   ;;  %vm2798_vm5 = vcmask 523264  }
  0xa4   : > { %3394 = vmatprep.subr.bf16.mxu0 %v3858_v0  ;;  %s3866_s24 = smov 80   ;;  %s3867_s18 = smov 112  }
  0xa5   : > { %s3868_s8 = smov 72   ;;  %s3871_s28 = smov 40  }
  0xa6   : > { %p448_p6 = scmp.lt.s32.totalorder %s3949_s19, 1  ;;  %p4550_p7 = scmp.ne.s32.totalorder %s4538_s27, 0 }
  0xa7   : > { %3396 = vmatpush3.bf16.msra.mxu0 %v3395_v7 }
  0xa8   : > { %3203 = vmatprep.subr.mxu0 %v3860_v1  ;;  %s449_s23 = scalar_select %p448_p6, %s3949_s19, 1 }
  0xaa   : > { %3201 = vmatmul.mubr.msk.f32.vlgmr.msra.gmra.mrb[0].mxu0 %vm458_vm1, %v4193_v8  ;;  %s3105_s10 = sshll.u32 %s449_s23, 4  ;;  %s447_s23 = scalar_lea.vmem [#allocation11], %s3043_s22 }
  0xab   : > { %3205 = vmatprep.mubr.msk.f32.mxu0 %vm3859_vm0, %v3860_v1 }
 0x17d   : > { %v4200_v9 = vpop.f32.mrb[0].mxu0 }
 0x17e   : > { %534 = vrot.lane.b32.xlu0 %v4200_v9, %s3861_s17  ;;  %v3202_v10 = vpop.f32.mrb[1].mxu0  ;;  %v4205_v11 = vmul.f32 0.35355338, %v4200_v9 }
 0x180   : > { %701 = vrot.lane.b32.xlu1 %v4205_v11, %s3862_s21 }
 0x182   : > { %703 = vrot.lane.b32.xlu0 %v4200_v9, %s3863_s30 }
 0x1f0   : > { %v535_v12 = vpop.permute.xlu0 %534 }
 0x1f1   : > { %3204 = vmatpush3.xpose.msk.msra.mxu0 %vm536_vm2, %v535_v12 }
 0x1f2   : > { %3213 = vmatprep.subr.mxu0 %v3860_v1  ;;  %v702_v14 = vpop.permute.xlu1 %701 }
 0x1f4   : > { %v704_v13 = vpop.permute.xlu0 %703  ;;  %3206 = vmatmul.mubr.msk.f32.vlgmr.msra.gmra.mrb[2].mxu0 %vm536_vm2, %v4205_v11 }
 0x1f5   : > { %3214 = vmatpush3.xpose.msk.msra.mxu0 %vm536_vm2, %v704_v13  ;;  %3215 = vmatprep.mubr.msk.f32.mxu0 %vm3859_vm0, %v3860_v1 }
 0x1f6   : > { %3223 = vmatprep.subr.mxu0 %v3860_v1 }
 0x1f8   : > { %3216 = vmatmul.mubr.msk.f32.vlgmr.msra.gmra.mrb[4].mxu0 %vm536_vm2, %v702_v14 }
 0x1f9   : > { %3225 = vmatprep.mubr.msk.f32.mxu0 %vm3859_vm0, %v3860_v1  ;;  %3224 = vmatpush3.msra.mxu0 %v867_v31 }
 0x1fa   : > { %3233 = vmatprep.subr.mxu0 %v3860_v1 }
 0x2c7   : > { %v608_v15 = vpop.f32.mrb[2].mxu0 }
 0x2c8   : > { %v3207_v16 = vpop.f32.mrb[3].mxu0  ;;  %v612_v17 = vsel %vm536_vm2, %v608_v15, -inf }
 0x2c9   : > { %613 = vmax.xlane.f32.xlu1 %v612_v17 }
 0x2cb   : > { %v775_v18 = vpop.f32.mrb[4].mxu0 }
 0x2cc   : > { %v3217_v19 = vpop.f32.mrb[5].mxu0  ;;  %v779_v20 = vsel %vm536_vm2, %v775_v18, -inf }
 0x2cd   : > { %780 = vmax.xlane.f32.xlu0 %v779_v20 }
 0x356   : > { %v614_v21 = vpop.xlane.xlu1 %613 }
 0x357   : > { %v615_v22 = vsub.f32 %v608_v15, %v614_v21 }
 0x359   : > { %v616_v23 = vmul.f32 1.442695, %v615_v22 }
 0x35a   : > { %v781_v24 = vpop.xlane.xlu0 %780 }
 0x35b   : > { %3595 = vpow2.f32 %v616_v23  ;;  %v782_v25 = vsub.f32 %v775_v18, %v781_v24  ;;  %v1421_v18 = vld [vmem:[%s4515_s3 + $0x18] sm:$0xff] }
 0x35d   : > { %v783_v26 = vmul.f32 1.442695, %v782_v25 }
 0x35f   : > { %3597 = vpow2.f32 %v783_v26 }
 0x365   : > { %v3596_v27 = vpop.eup %3595 }
 0x366   : > { %v618_v28 = vsel %vm536_vm2, %v3596_v27, 0.0 }
 0x367   : > { %619 = vadd.xlane.f32.xlu0 %v618_v28 }
 0x369   : > { %v3598_v29 = vpop.eup %3597 }
 0x36a   : > { %v785_v30 = vsel %vm536_vm2, %v3598_v29, 0.0 }
 0x36b   : > { %786 = vadd.xlane.f32.xlu1 %v785_v30 }
 0x37c   : > { %791 = vrot.lane.b32.xlu1 %v4200_v9, %s3864_s25  ;;  %s3869_s25 = smov 104  }
 0x37d   : > { %624 = vrot.lane.b32.xlu0 %v4200_v9, %s3865_s20  ;;  %s3870_s20 = smov 48  }
 0x380   : > { %1016 = vrot.lane.b32.xlu1 %v4200_v9, %s3866_s24 }
 0x381   : > { %1014 = vrot.lane.b32.xlu0 %v4205_v11, %s3867_s18 }
 0x3f4   : > { %v620_v32 = vpop.xlane.xlu0 %619 }
 0x3f5   : > { %3599 = vrcp.f32 %v620_v32 }
 0x3f8   : > { %v787_v33 = vpop.xlane.xlu1 %786  ;;  %v625_v34 = vpop.permute.xlu0 %624 }
 0x3f9   : > { %3601 = vrcp.f32 %v787_v33  ;;  %3209 = vmatpush3.msra.mxu1 %v625_v34 }
 0x3fa   : > { %3218 = vmatprep.subr.mxu1 %v3860_v1 }
 0x3fc   : > { %v792_v37 = vpop.permute.xlu1 %791  ;;  %v1015_v46 = vpop.permute.xlu0 %1014 }
 0x3ff   : > { %v3600_v35 = vpop.eup %3599 }
 0x400   : > { %v623_v36 = vmul.f32 %v3600_v35, %v3596_v27  ;;  %v1017_v44 = vpop.permute.xlu1 %1016 }
 0x402   : > { %3211 = vmatmul.mubr.msk.f32.vlgmr.msra.gmra.mrb[0].mxu1 %vm536_vm2, %v623_v36  ;;  %v1602_v36 = vld [vmem:[#allocation7] sm:$0xff] }
 0x403   : > { %v3602_v38 = vpop.eup %3601  ;;  %3219 = vmatpush3.msra.mxu1 %v792_v37  ;;  %3220 = vmatprep.mubr.msk.f32.mxu1 %vm3859_vm0, %v3860_v1  ;;  %v1603_v37 = vld [vmem:[#allocation7 + $0x8] sm:$0xff] }
 0x404   : > { %v790_v39 = vmul.f32 %v3602_v38, %v3598_v29  ;;  %3228 = vmatprep.subr.mxu1 %v3860_v1  ;;  %v3403_v38 = vpack.c.bf16 %v1603_v37, %v1602_v36 }
 0x406   : > { %3221 = vmatmul.mubr.msk.f32.vlgmr.msra.gmra.mrb[2].mxu1 %vm536_vm2, %v790_v39  ;;  %v1604_v39 = vld [vmem:[#allocation7 + $0x10] sm:$0xff] }
 0x407   : > { %3230 = vmatprep.mubr.msk.f32.mxu1 %vm3859_vm0, %v3860_v1  ;;  %3229 = vmatpush3.msra.mxu1 %v700_v40  ;;  %v1605_v40 = vld [vmem:[#allocation7 + $0x18] sm:$0xff] }
 0x408   : > { %3238 = vmatprep.subr.mxu1 %v3860_v1 }
 0x4d5   : > { %v696_v41 = vpop.f32.mrb[0].mxu1 }
 0x4d6   : > { %v3212_v42 = vpop.f32.mrb[1].mxu1  ;;  %3231 = vmatmul.mubr.msk.f32.vlgmr.msra.gmra.mrb[4].mxu1 %vm536_vm2, %v696_v41 }
 0x4d7   : > { %3240 = vmatprep.mubr.msk.f32.mxu1 %vm3859_vm0, %v3860_v1 }
 0x4d9   : > { %v863_v43 = vpop.f32.mrb[2].mxu1 }
 0x4da   : > { %v3222_v45 = vpop.f32.mrb[3].mxu1  ;;  %3226 = vmatmul.mubr.msk.f32.vlgmr.msra.gmra.mrb[6].mxu0 %vm536_vm2, %v863_v43  ;;  %v1525_v43 = vld [vmem:[#allocation5] sm:$0xff] }
 0x4db   : > { %3234 = vmatpush3.xpose.msk.msra.mxu0 %vm536_vm2, %v1017_v44  ;;  %3235 = vmatprep.mubr.msk.f32.mxu0 %vm3859_vm0, %v3860_v1  ;;  %v1526_v44 = vld [vmem:[#allocation5 + $0x8] sm:$0xff] }
 0x4dc   : > { %3243 = vmatprep.subr.mxu0 %v3860_v1  ;;  %v3398_v45 = vpack.c.bf16 %v1526_v44, %v1525_v43  ;;  %v2033_v44 = vld [vmem:[#allocation8 + $0x8] sm:$0xff] }
 0x4de   : > { %3236 = vmatmul.mubr.msk.f32.vlgmr.msra.gmra.mrb[8].mxu0 %vm536_vm2, %v1015_v46  ;;  %v1527_v46 = vld [vmem:[#allocation5 + $0x10] sm:$0xff] }
 0x4df   : > { %3245 = vmatprep.mubr.msk.f32.mxu0 %vm3859_vm0, %v3860_v1  ;;  %3244 = vmatpush3.msra.mxu0 %v1180_v4 }
 0x4e0   : > { %3253 = vmatprep.subr.mxu0 %v3860_v1 }
 0x5a9   : > { %v1010_v47 = vpop.f32.mrb[4].mxu1 }
 0x5aa   : > { %v3232_v48 = vpop.f32.mrb[5].mxu1 }
 0x5ad   : > { %v937_v49 = vpop.f32.mrb[6].mxu0 }
 0x5ae   : > { %v1011_v50 = vadd.f32 %v1010_v47, %v937_v49  ;;  %v3227_v51 = vpop.f32.mrb[7].mxu0  ;;  %v1528_v47 = vld [vmem:[#allocation5 + $0x18] sm:$0xff] }
 0x5af   : > { %v3401_v48 = vpack.c.bf16 %v1528_v47, %v1527_v46 }
 0x5b1   : > { %v1088_v52 = vpop.f32.mrb[8].mxu0 }
 0x5b2   : > { %v3237_v53 = vpop.f32.mrb[9].mxu0  ;;  %v1092_v54 = vsel %vm536_vm2, %v1088_v52, -inf }
 0x5b3   : > { %1093 = vmax.xlane.f32.xlu1 %v1092_v54  ;;  %v3068_v53 = vld [vmem:[%s4521_s9 + $0x2] ss:$0 sm:$0xff] }
 0x5c4   : > { %1257 = vrot.lane.b32.xlu1 %v4200_v9, %s3868_s8 }
 0x5c8   : > { %1255 = vrot.lane.b32.xlu1 %v4205_v11, %s3869_s25 }
 0x640   : > { %v1094_v55 = vpop.xlane.xlu1 %1093 }
 0x641   : > { %v1095_v56 = vsub.f32 %v1088_v52, %v1094_v55  ;;  %v3069_v55 = vld [vmem:[%s4521_s9 + $0x3] ss:$0 sm:$0xff] }
 0x643   : > { %v1096_v57 = vmul.f32 1.442695, %v1095_v56 }
 0x644   : > { %v1258_v63 = vpop.permute.xlu1 %1257 }
 0x645   : > { %3603 = vpow2.f32 %v1096_v57 }
 0x648   : > { %v1256_v3 = vpop.permute.xlu1 %1255 }
 0x64f   : > { %v3604_v58 = vpop.eup %3603 }
 0x650   : > { %v1098_v59 = vsel %vm536_vm2, %v3604_v58, 0.0 }
 0x651   : > { %1099 = vadd.xlane.f32.xlu0 %v1098_v59 }
 0x667   : > { %1104 = vrot.lane.b32.xlu0 %v4200_v9, %s3870_s20  ;;  %s452_s20 = scalar_lea.vmem %s4513_s1, %s3105_s10  ;;  %s2913_s10 = sshll.u32 %s447_s23, 4  ;;  %s4469_s10 = int_to_ptr.vmem [resolvable:$true] %s2913_s10 }
 0x668   : > { %v1523_v41 = vld [vmem:[%s452_s20] sm:$0xff]  ;;  %v1524_v42 = vld [vmem:[%s452_s20 + $0x8] sm:$0xff]  ;;  %s3102_s20 = sshll.u32 %s3949_s19, 7  ;;  %s3872_s19 = smov [#allocation11]  }
 0x669   : > { %s3779_s22 = sshll.u32 %s3872_s19, 4  ;;  %s3780_s22 = int_to_ptr.vmem [resolvable:$false] %s3779_s22 }
 0x66a   : > { %p3782_p3 = scmp.lt.s32.totalorder %s4469_s10, %s3780_s22 }
 0x6de   : > { %v1100_v60 = vpop.xlane.xlu0 %1099 }
 0x6df   : > { %3605 = vrcp.f32 %v1100_v60 }
 0x6e2   : > { %v1105_v61 = vpop.permute.xlu0 %1104 }
 0x6e3   : > { %3239 = vmatpush3.msra.mxu1 %v1105_v61 }
 0x6e4   : > { %3248 = vmatprep.subr.mxu1 %v3860_v1 }
 0x6e9   : > { %v3606_v62 = vpop.eup %3605 }
 0x6ea   : > { %v1103_v2 = vmul.f32 %v3606_v62, %v3604_v58 }
 0x6ec   : > { %3241 = vmatmul.mubr.msk.f32.vlgmr.msra.gmra.mrb[6].mxu1 %vm536_vm2, %v1103_v2 }
 0x6ed   : > { %3249 = vmatpush3.xpose.msk.msra.mxu1 %vm536_vm2, %v1258_v63  ;;  %3250 = vmatprep.mubr.msk.f32.mxu1 %vm3859_vm0, %v3860_v1 }
 0x6ee   : > { %3258 = vmatprep.subr.mxu1 %v3860_v1 }
 0x6f0   : > { %3251 = vmatmul.mubr.msk.f32.vlgmr.msra.gmra.mrb[8].mxu1 %vm536_vm2, %v1256_v3 }
 0x6f1   : > { %3260 = vmatprep.mubr.msk.f32.mxu1 %vm3859_vm0, %v3860_v1  ;;  %3259 = vmatpush3.msra.mxu1 %v1421_v18 }
 0x6f2   : > { %3404 = vmatprep.subr.bf16.mxu1 %v3403_v38 }
 0x7bf   : > { %v1176_v5 = vpop.f32.mrb[6].mxu1 }
 0x7c0   : > { %v3242_v6 = vpop.f32.mrb[7].mxu1  ;;  %3246 = vmatmul.mubr.msk.f32.vlgmr.msra.gmra.mrb[10].mxu0 %vm536_vm2, %v1176_v5 }
 0x7c1   : > { %3255 = vmatprep.mubr.msk.f32.mxu0 %vm3859_vm0, %v3860_v1 }
 0x7c3   : > { %v1329_v7 = vpop.f32.mrb[8].mxu1 }
 0x7c4   : > { %v3252_v10 = vpop.f32.mrb[9].mxu1  ;;  %v1333_v11 = vsel %vm536_vm2, %v1329_v7, -inf }
 0x7c5   : > { %1334 = vmax.xlane.f32.xlu0 %v1333_v11 }
 0x7db   : > { %1345 = vrot.lane.b32.xlu0 %v4200_v9, %s3871_s28 }
 0x852   : > { %v1335_v12 = vpop.xlane.xlu0 %1334 }
 0x853   : > { %v1336_v13 = vsub.f32 %v1329_v7, %v1335_v12 }
 0x855   : > { %v1337_v14 = vmul.f32 1.442695, %v1336_v13 }
 0x856   : > { %v1346_v15 = vpop.permute.xlu0 %1345 }
 0x857   : > { %3607 = vpow2.f32 %v1337_v14  ;;  %3254 = vmatpush3.msra.mxu0 %v1346_v15 }
 0x858   : > { %3397 = vmatprep.subr.bf16.mxu0 %v3858_v0 }
 0x861   : > { %v3608_v16 = vpop.eup %3607 }
 0x862   : > { %v1339_v17 = vsel %vm536_vm2, %v3608_v16, 0.0 }
 0x863   : > { %1340 = vadd.xlane.f32.xlu1 %v1339_v17 }
 0x893   : > { %v1250_v19 = vpop.f32.mrb[10].mxu0 }
 0x894   : > { %v1254_v20 = vadd.f32 %v1250_v19, %v1011_v50  ;;  %v3247_v9 = vpop.f32.mrb[11].mxu0 }
 0x8f0   : > { %v1341_v21 = vpop.xlane.xlu1 %1340 }
 0x8f1   : > { %3609 = vrcp.f32 %v1341_v21 }
 0x8fb   : > { %v3610_v22 = vpop.eup %3609 }
 0x8fc   : > { %v1344_v23 = vmul.f32 %v3610_v22, %v3608_v16 }
 0x8fe   : > { %3256 = vmatmul.mubr.msk.f32.vlgmr.msra.gmra.mrb[12].mxu0 %vm536_vm2, %v1344_v23 }
 0x8ff   : > { %3271 = vmatprep.mubr.msk.f32.mxu0 %vm3859_vm0, %v3860_v1  ;;  %3399 = vmatpush3.bf16.msra.mxu0 %v3398_v45 }
 0x900   : > { %3400 = vmatprep.subr.bf16.mxu0 %v3858_v0 }
 0x903   : > { %3402 = vmatpush3.bf16.msra.mxu0 %v3401_v48 }
 0x904   : > { %3411 = vmatprep.subr.bf16.mxu0 %v3858_v0 }
 0x9d1   : > { %v1417_v24 = vpop.f32.mrb[12].mxu0 }
 0x9d2   : > { %v3257_v25 = vpop.f32.mrb[13].mxu0  ;;  %3261 = vmatmul.mubr.msk.f32.vlgmr.msra.gmra.mrb[10].mxu1 %vm536_vm2, %v1417_v24 }
 0x9d3   : > { %3406 = vmatpush3.bf16.msra.mxu1 %v3403_v38  ;;  %3282 = vmatprep.mubr.msk.f32.mxu1 %vm458_vm1, %v1523_v41  ;;  %v1859_v25 = vld [vmem:[#allocation8] sm:$0xff] }
 0xaa5   : > { %v1491_v26 = vpop.f32.mrb[10].mxu1 }
 0xaa6   : > { %v1495_v27 = vadd.f32 %v1491_v26, %v1254_v20  ;;  %v3262_v28 = vpop.f32.mrb[11].mxu1 }
 0xaa8   : > { %v1496_v29 = vadd.f32 %v1495_v27, %v4193_v8  ;;  %v3407_v8 = vpack.c.bf16 %v1605_v40, %v1604_v39 }
 0xaaa   : > { %v1497_v30 = vsel %vm458_vm1, %v1496_v29, 0.0  ;;  %3408 = vmatprep.subr.bf16.mxu1 %v3407_v8 }
 0xaab   : > { %1498 = vadd.xlane.f32.xlu1 %v1497_v30  ;;  %3410 = vmatpush3.bf16.msra.mxu1 %v3407_v8 }
 0xaac   : > { %3415 = vmatprep.subr.bf16.mxu1 %v3858_v0 }
 0xaae   : > { %3283 = vmatmul.mubr.msk.f32.vlgmr.msra.gmra.mrb[12].mxu1 %vm458_vm1, %v1524_v42 }
 0xaaf   : > { %3296 = vmatprep.mubr.msk.f32.mxu1 %vm3859_vm0, %v3860_v1 }
 0xb38   : > { %v1499_v31 = vpop.xlane.xlu1 %1498 }
 0xb39   : > { %v1501_v32 = vmul.f32 0.03125, %v1499_v31 }
 0xb3b   : > { %v1502_v33 = vsub.f32 %v1496_v29, %v1501_v32 }
 0xb3d   : > { %v1503_v34 = vmul.f32 %v1502_v33, %v1502_v33 }
 0xb3f   : > { %v1504_v35 = vsel %vm458_vm1, %v1503_v34, 0.0 }
 0xb40   : > { %1505 = vadd.xlane.f32.xlu1 %v1504_v35 }
 0xb81   : > { %v3284_v58 = vpop.f32.mrb[12].mxu1 }
 0xb82   : > { %v1678_v59 = vpop.f32.mrb[13].mxu1 }
 0xb83   : > { %v4326_v61 = vpack.i.bf16 %v3284_v58, %v1678_v59  ;;  %v3412_v62 = vpack.c.bf16 %v3284_v58, %v1678_v59 }
 0xb85   : > { %3566 = vrot.lane.b32.xlu0 %v4326_v61, %s3862_s21 }
 0xbcd   : > { %v1506_v49 = vpop.xlane.xlu1 %1505 }
 0xbce   : > { %v1507_v50 = vmul.f32 0.03125, %v1506_v49 }
 0xbd0   : > { %v1508_v51 = vadd.f32 1e-05, %v1507_v50 }
 0xbd2   : > { %3611 = vrsqrt.f32 %v1508_v51 }
 0xbdc   : > { %v3612_v52 = vpop.eup %3611 }
 0xbdd   : > { %v1510_v54 = vmul.f32 %v3612_v52, %v1502_v33 }
 0xbdf   : > { %v1516_v56 = vmul.f32 %v3068_v53, %v1510_v54 }
 0xbe1   : > { %v4314_v57 = vadd.f32 %v3069_v55, %v1516_v56 }
 0xbe3   : > { %3272 = vmatmul.mubr.msk.f32.vlgmr.msra.gmra.mrb[14].mxu0 %vm458_vm1, %v4314_v57 }
 0xbe4   : > { %3289 = vmatprep.mubr.msk.f32.mxu0 %vm3859_vm0, %v3860_v1  ;;  %3414 = vmatpush3.bf16.xpose.msk.msra.mxu0 %vm4322_vm3, %v3412_v62 }
 0xbe5   : > { %3422 = vmatprep.subr.bf16.mxu0 %v3858_v0 }
 0xbf7   : > { %v3567_v19 = vpop.permute.xlu0 %3566 }
 0xbf8   : > { %v3569_v9 = vunpack.i.h.bf16 %v3567_v19  ;;  %v3568_v21 = vunpack.i.l.bf16 %v3567_v19 }
 0xbfa   : > { %v3419_v23 = vpack.c.bf16 %v3569_v9, %v3568_v21 }
 0xcb6   : > { %v1598_v63 = vpop.f32.mrb[14].mxu0 }
 0xcb7   : > { %v1687_v2 = vmul.f32 0.35355338, %v1598_v63  ;;  %v3273_v3 = vpop.f32.mrb[15].mxu0 }
 0xcb9   : > { %1860 = vrot.lane.b32.xlu0 %v1687_v2, %s3862_s21  ;;  %3290 = vmatmul.mubr.msk.f32.vlgmr.msra.gmra.mrb[16].mxu0 %vm536_vm2, %v1687_v2 }
 0xcba   : > { %3310 = vmatprep.mubr.msk.f32.mxu0 %vm3859_vm0, %v3860_v1 }
 0xd2b   : > { %v1861_v24 = vpop.permute.xlu0 %1860 }
 0xd8c   : > { %v1763_v4 = vpop.f32.mrb[16].mxu0 }
 0xd8d   : > { %v3291_v5 = vpop.f32.mrb[17].mxu0  ;;  %v1768_v6 = vsel %vm1767_vm4, %v1763_v4, -inf }
 0xd8e   : > { %1769 = vmax.xlane.f32.xlu1 %v1768_v6 }
 0xe1b   : > { %v1770_v7 = vpop.xlane.xlu1 %1769 }
 0xe1c   : > { %v1771_v10 = vsub.f32 %v1763_v4, %v1770_v7 }
 0xe1e   : > { %v1772_v11 = vmul.f32 1.442695, %v1771_v10 }
 0xe20   : > { %3613 = vpow2.f32 %v1772_v11 }
 0xe2a   : > { %v3614_v12 = vpop.eup %3613 }
 0xe2b   : > { %v1774_v13 = vsel %vm1767_vm4, %v3614_v12, 0.0 }
 0xe2c   : > { %1775 = vadd.xlane.f32.xlu1 %v1774_v13 }
 0xe3d   : > { %3561 = vrot.lane.b32.xlu1 %v4326_v61, %s3861_s17  ;;  %s4549_s17 = sld [smem:[#allocation18_spill]] }
 0xe43   : > { %s4467_s21 = scalar_lea.hbm %s4549_s17, %s3102_s20 }
 0xeb9   : > { %v1776_v14 = vpop.xlane.xlu1 %1775 }
 0xeba   : > { %3615 = vrcp.f32 %v1776_v14 }
 0xebd   : > { %v3562_v15 = vpop.permute.xlu1 %3561 }
 0xebe   : > { %v3564_v16 = vunpack.i.h.bf16 %v3562_v15  ;;  %v3563_v17 = vunpack.i.l.bf16 %v3562_v15 }
 0xec0   : > { %v3416_v18 = vpack.c.bf16 %v3564_v16, %v3563_v17 }
 0xec2   : > { %3417 = vmatpush3.bf16.msra.mxu1 %v3416_v18 }
 0xec3   : > { %3418 = vmatprep.subr.bf16.mxu1 %v3858_v0 }
 0xec4   : > { %v3616_v20 = vpop.eup %3615 }
 0xec5   : > { %v1779_v22 = vmul.f32 %v3616_v20, %v3614_v12 }
 0xec7   : > { %3297 = vmatmul.mubr.msk.f32.vlgmr.msra.gmra.mrb[14].mxu1 %vm1767_vm4, %v1779_v22 }
 0xec8   : > { %3303 = vmatprep.mubr.msk.f32.mxu1 %vm3859_vm0, %v3860_v1 }
 0xecb   : > { %3421 = vmatpush3.bf16.xpose.msk.msra.mxu1 %vm4322_vm3, %v3419_v23 }
 0xecc   : > { %3318 = vmatprep.subr.mxu1 %v3860_v1 }
 0xed2   : > { %3304 = vmatmul.mubr.msk.f32.vlgmr.msra.gmra.mrb[16].mxu1 %vm536_vm2, %v1861_v24  ;;  %v2353_v24 = vld [vmem:[#allocation8 + $0x10] sm:$0xff] }
 0xed3   : > { %3320 = vmatprep.mubr.msk.f32.mxu1 %vm3859_vm0, %v3860_v1  ;;  %3319 = vmatpush3.msra.mxu1 %v1859_v25 }
 0xed4   : > { %3429 = vmatprep.subr.bf16.mxu1 %v3858_v0 }
 0xf9a   : > { %v1855_v26 = vpop.f32.mrb[14].mxu1 }
 0xf9b   : > { %v3298_v27 = vpop.f32.mrb[15].mxu1  ;;  %3321 = vmatmul.mubr.msk.f32.vlgmr.msra.gmra.mrb[18].mxu1 %vm536_vm2, %v1855_v26 }
 0xf9c   : > { %3334 = vmatprep.mubr.msk.f32.mxu1 %vm3859_vm0, %v3860_v1 }
 0xfa5   : > { %v1938_v28 = vpop.f32.mrb[16].mxu1 }
 0xfa6   : > { %v3305_v29 = vpop.f32.mrb[17].mxu1  ;;  %v1942_v30 = vsel %vm1767_vm4, %v1938_v28, -inf }
 0xfa7   : > { %1943 = vmax.xlane.f32.xlu0 %v1942_v30 }
 0xfbd   : > { %3571 = vrot.lane.b32.xlu0 %v4326_v61, %s3863_s30  ;;  %s4548_s30 = sld [smem:[#allocation17_spill]] }
 0xfc1   : > { %2180 = vrot.lane.b32.xlu0 %v1687_v2, %s3867_s18 }
 0xfc5   : > { %3581 = vrot.lane.b32.xlu0 %v4326_v61, %s3869_s25 }
 0xfc9   : > { %2428 = vrot.lane.b32.xlu0 %v1687_v2, %s3869_s25 }
0x1034   : > { %v1944_v31 = vpop.xlane.xlu0 %1943 }
0x1035   : > { %v1945_v32 = vsub.f32 %v1938_v28, %v1944_v31 }
0x1037   : > { %v1946_v33 = vmul.f32 1.442695, %v1945_v32 }
0x1038   : > { %v3572_v34 = vpop.permute.xlu0 %3571 }
0x1039   : > { %3617 = vpow2.f32 %v1946_v33  ;;  %v3574_v35 = vunpack.i.h.bf16 %v3572_v34  ;;  %v3573_v36 = vunpack.i.l.bf16 %v3572_v34  ;;  %v2601_v33 = vld [vmem:[#allocation8 + $0x18] sm:$0xff] }
0x103b   : > { %v3423_v37 = vpack.c.bf16 %v3574_v35, %v3573_v36 }
0x103c   : > { %v2181_v46 = vpop.permute.xlu0 %2180 }
0x103d   : > { %3424 = vmatpush3.bf16.msra.mxu0 %v3423_v37 }
0x103e   : > { %3313 = vmatprep.subr.mxu0 %v3860_v1 }
0x1040   : > { %v3582_v51 = vpop.permute.xlu0 %3581 }
0x1041   : > { %v3584_v53 = vunpack.i.h.bf16 %v3582_v51  ;;  %v3583_v54 = vunpack.i.l.bf16 %v3582_v51  ;;  %v2705_v51 = vld [vmem:[#allocation10 + $0x18] sm:$0xff] }
0x1043   : > { %v3618_v38 = vpop.eup %3617  ;;  %v3433_v55 = vpack.c.bf16 %v3584_v53, %v3583_v54  ;;  %v2786_v53 = vld [vmem:[%s4548_s30 + $0x8] sm:$0xff]  ;;  %v2787_v54 = vld [vmem:[%s4548_s30 + $0x10] sm:$0xff] }
0x1044   : > { %v1948_v39 = vsel %vm1767_vm4, %v3618_v38, 0.0  ;;  %v2429_v56 = vpop.permute.xlu0 %2428 }
0x1045   : > { %1949 = vadd.xlane.f32.xlu1 %v1948_v39 }
0x1056   : > { %3576 = vrot.lane.b32.xlu1 %v4326_v61, %s3867_s18  ;;  %s3775_s18 = scalar_lea.vmem %s4469_s10, 128 }
0x1057   : > { %p3776_p5 = scmp.ne.s32.totalorder %s4469_s10, %s3775_s18 }
0x1059   : > { %p3777_p9 = pnand %p3776_p5, %p4550_p7 }
0x105b   : > { %p3778_p12 = pneg %p3777_p9 }
0x106e   : > { %v2176_v40 = vpop.f32.mrb[18].mxu1 }
0x106f   : > { %v3322_v8 = vpop.f32.mrb[19].mxu1 }
0x10d2   : > { %v1950_v41 = vpop.xlane.xlu1 %1949 }
0x10d3   : > { %3619 = vrcp.f32 %v1950_v41 }
0x10d6   : > { %v3577_v45 = vpop.permute.xlu1 %3576 }
0x10d7   : > { %v3579_v47 = vunpack.i.h.bf16 %v3577_v45  ;;  %v3578_v48 = vunpack.i.l.bf16 %v3577_v45 }
0x10d9   : > { %v3426_v49 = vpack.c.bf16 %v3579_v47, %v3578_v48  ;;  %v2702_v48 = vld [vmem:[#allocation10] sm:$0xff] }
0x10dd   : > { %v3620_v42 = vpop.eup %3619 }
0x10de   : > { %v1953_v43 = vmul.f32 %v3620_v42, %v3618_v38 }
0x10e0   : > { %3311 = vmatmul.mubr.msk.f32.vlgmr.msra.gmra.mrb[18].mxu0 %vm1767_vm4, %v1953_v43 }
0x10e1   : > { %3314 = vmatpush3.msra.mxu0 %v2033_v44  ;;  %3315 = vmatprep.mubr.msk.f32.mxu0 %vm3859_vm0, %v3860_v1 }
0x10e2   : > { %3425 = vmatprep.subr.bf16.mxu0 %v3858_v0 }
0x11b3   : > { %v2029_v50 = vpop.f32.mrb[18].mxu0 }
0x11b4   : > { %v3312_v52 = vpop.f32.mrb[19].mxu0  ;;  %3316 = vmatmul.mubr.msk.f32.vlgmr.msra.gmra.mrb[20].mxu0 %vm536_vm2, %v2029_v50 }
0x11b5   : > { %3428 = vmatpush3.bf16.xpose.msk.msra.mxu0 %vm4322_vm3, %v3426_v49  ;;  %3327 = vmatprep.mubr.msk.f32.mxu0 %vm3859_vm0, %v3860_v1  ;;  %v2703_v49 = vld [vmem:[#allocation10 + $0x8] sm:$0xff] }
0x11b6   : > { %3432 = vmatprep.subr.bf16.mxu0 %v3858_v0  ;;  %v3440_v50 = vpack.c.bf16 %v2703_v49, %v2702_v48 }
0x11bc   : > { %3328 = vmatmul.mubr.msk.f32.vlgmr.msra.gmra.mrb[22].mxu0 %vm536_vm2, %v2181_v46 }
0x11bd   : > { %3435 = vmatpush3.bf16.xpose.msk.msra.mxu0 %vm4322_vm3, %v3433_v55  ;;  %3346 = vmatprep.mubr.msk.f32.mxu0 %vm3859_vm0, %v3860_v1 }
0x11be   : > { %3439 = vmatprep.subr.bf16.mxu0 %v3858_v0 }
0x11c4   : > { %3347 = vmatmul.mubr.msk.f32.vlgmr.msra.gmra.mrb[24].mxu0 %vm536_vm2, %v2429_v56  ;;  %v2788_v56 = vld [vmem:[%s4548_s30 + $0x18] sm:$0xff] }
0x11c5   : > { %3369 = vmatprep.mubr.msk.f32.mxu0 %vm3859_vm0, %v3860_v1  ;;  %3441 = vmatpush3.bf16.msra.mxu0 %v3440_v50 }
0x11c6   : > { %3442 = vmatprep.subr.bf16.mxu0 %v3858_v0 }
0x1287   : > { %v2103_v58 = vpop.f32.mrb[20].mxu0 }
0x1288   : > { %v2177_v59 = vadd.f32 %v2176_v40, %v2103_v58  ;;  %v3317_v62 = vpop.f32.mrb[21].mxu0  ;;  %v3449_v58 = vpack.c.bf16 %v2788_v56, %v2787_v54 }
0x1289   : > { %v2790_v62 = vld [vmem:[%s4548_s30 + $0x28] sm:$0xff] }
0x128f   : > { %v2258_v63 = vpop.f32.mrb[22].mxu0 }
0x1290   : > { %v3329_v2 = vpop.f32.mrb[23].mxu0  ;;  %v2262_v3 = vsel %vm1767_vm4, %v2258_v63, -inf }
0x1291   : > { %2263 = vmax.xlane.f32.xlu1 %v2262_v3 }
0x1297   : > { %v2506_v60 = vpop.f32.mrb[24].mxu0 }
0x1298   : > { %v3348_v4 = vpop.f32.mrb[25].mxu0  ;;  %v2510_v5 = vsel %vm1767_vm4, %v2506_v60, -inf }
0x1299   : > { %2511 = vmax.xlane.f32.xlu1 %v2510_v5  ;;  %v3093_v5 = vld [vmem:[%s4521_s9 + $0x6] ss:$0 sm:$0xff] }
0x131e   : > { %v2264_v6 = vpop.xlane.xlu1 %2263 }
0x131f   : > { %v2265_v7 = vsub.f32 %v2258_v63, %v2264_v6 }
0x1321   : > { %v2266_v10 = vmul.f32 1.442695, %v2265_v7  ;;  %v3094_v7 = vld [vmem:[%s4521_s9 + $0x7] ss:$0 sm:$0xff] }
0x1323   : > { %3621 = vpow2.f32 %v2266_v10 }
0x1326   : > { %v2512_v11 = vpop.xlane.xlu1 %2511 }
0x1327   : > { %v2513_v12 = vsub.f32 %v2506_v60, %v2512_v11 }
0x1329   : > { %v2514_v13 = vmul.f32 1.442695, %v2513_v12  ;;  %v2792_v12 = vld [vmem:[%s4548_s30 + $0x38] sm:$0xff] }
0x132b   : > { %3623 = vpow2.f32 %v2514_v13 }
0x132d   : > { %v3622_v14 = vpop.eup %3621 }
0x132e   : > { %v2268_v15 = vsel %vm1767_vm4, %v3622_v14, 0.0 }
0x132f   : > { %2269 = vadd.xlane.f32.xlu0 %v2268_v15 }
0x1335   : > { %v3624_v16 = vpop.eup %3623 }
0x1336   : > { %v2516_v17 = vsel %vm1767_vm4, %v3624_v16, 0.0 }
0x1337   : > { %2517 = vadd.xlane.f32.xlu1 %v2516_v17 }
0x1345   : > { %3586 = vrot.lane.b32.xlu0 %v4326_v61, %s3866_s24  ;;  %s2900_s24 = scalar_lea.sflag [#allocation4], %s4156_s4 }
0x1348   : > { %3591 = vrot.lane.b32.xlu1 %v4326_v61, %s3868_s8  ;;  %s3781_s8 = scalar_lea.vmem %s3780_s22, 256 }
0x1349   : > { %p3783_p13 = scmp.lt.s32.totalorder %s3781_s8, %s3775_s18 }
0x134b   : > { %p3784_p0 = por %p3783_p13, %p3782_p3 }
0x134d   : > { %p3785_p2 = pnand %p3784_p0, %p3778_p12 }
0x13bc   : > { %v2270_v18 = vpop.xlane.xlu0 %2269 }
0x13bd   : > { %3625 = vrcp.f32 %v2270_v18 }
0x13c0   : > { %v3587_v19 = vpop.permute.xlu0 %3586 }
0x13c1   : > { %v3589_v20 = vunpack.i.h.bf16 %v3587_v19  ;;  %v3588_v9 = vunpack.i.l.bf16 %v3587_v19  ;;  %v3097_v19 = vld [vmem:[%s4521_s9 + $0x1] ss:$0 sm:$0xff] }
0x13c3   : > { %v3430_v21 = vpack.c.bf16 %v3589_v20, %v3588_v9 }
0x13c4   : > { %v2518_v61 = vpop.xlane.xlu1 %2517 }
0x13c5   : > { %3431 = vmatpush3.bf16.msra.mxu1 %v3430_v21  ;;  %3627 = vrcp.f32 %v2518_v61 }
0x13c6   : > { %3337 = vmatprep.subr.mxu1 %v3860_v1 }
0x13c7   : > { %v3626_v22 = vpop.eup %3625 }
0x13c8   : > { %v2273_v23 = vmul.f32 %v3626_v22, %v3622_v14  ;;  %v3592_v25 = vpop.permute.xlu1 %3591  ;;  %v3095_v14 = vld [vmem:[%s4521_s9] ss:$0 sm:$0xff] }
0x13c9   : > { %v3594_v26 = vunpack.i.h.bf16 %v3592_v25  ;;  %v3593_v27 = vunpack.i.l.bf16 %v3592_v25 }
0x13ca   : > { %3335 = vmatmul.mubr.msk.f32.vlgmr.msra.gmra.mrb[20].mxu1 %vm1767_vm4, %v2273_v23 }
0x13cb   : > { %3338 = vmatpush3.msra.mxu1 %v2353_v24  ;;  %3339 = vmatprep.mubr.msk.f32.mxu1 %vm3859_vm0, %v3860_v1  ;;  %v3437_v29 = vpack.c.bf16 %v3594_v26, %v3593_v27 }
0x13cc   : > { %3436 = vmatprep.subr.bf16.mxu1 %v3858_v0 }
0x13cf   : > { %v3628_v28 = vpop.eup %3627 }
0x13d0   : > { %v2521_v32 = vmul.f32 %v3628_v28, %v3624_v16 }
0x149d   : > { %v2349_v30 = vpop.f32.mrb[20].mxu1 }
0x149e   : > { %v3336_v31 = vpop.f32.mrb[21].mxu1  ;;  %3340 = vmatmul.mubr.msk.f32.vlgmr.msra.gmra.mrb[22].mxu1 %vm536_vm2, %v2349_v30 }
0x149f   : > { %3438 = vmatpush3.bf16.msra.mxu1 %v3437_v29  ;;  %3353 = vmatprep.mubr.msk.f32.mxu1 %vm3859_vm0, %v3860_v1 }
0x14a0   : > { %3356 = vmatprep.subr.mxu1 %v3860_v1 }
0x14a2   : > { %3354 = vmatmul.mubr.msk.f32.vlgmr.msra.gmra.mrb[24].mxu1 %vm1767_vm4, %v2521_v32  ;;  %v3099_v32 = vld [vmem:[%s4521_s9 + $0x4] ss:$0 sm:$0xff] }
0x14a3   : > { %3358 = vmatprep.mubr.msk.f32.mxu1 %vm3859_vm0, %v3860_v1  ;;  %3357 = vmatpush3.msra.mxu1 %v2601_v33 }
0x14a4   : > { %3445 = vmatprep.subr.bf16.mxu1 %v3858_v0 }
0x1571   : > { %v2423_v34 = vpop.f32.mrb[22].mxu1 }
0x1572   : > { %v2427_v35 = vadd.f32 %v2423_v34, %v2177_v59  ;;  %v3341_v36 = vpop.f32.mrb[23].mxu1  ;;  %v2789_v59 = vld [vmem:[%s4548_s30 + $0x20] sm:$0xff] }
0x1573   : > { %v3452_v63 = vpack.c.bf16 %v2790_v62, %v2789_v59  ;;  %v3100_v34 = vld [vmem:[%s4521_s9 + $0x5] ss:$0 sm:$0xff] }
0x1575   : > { %v2597_v37 = vpop.f32.mrb[24].mxu1 }
0x1576   : > { %v3355_v38 = vpop.f32.mrb[25].mxu1  ;;  %3359 = vmatmul.mubr.msk.f32.vlgmr.msra.gmra.mrb[26].mxu1 %vm536_vm2, %v2597_v37 }
0x1577   : > { %3388 = vmatprep.mubr.msk.f32.mxu1 %vm3859_vm0, %v3860_v1  ;;  %v2704_v1 = vld [vmem:[#allocation10 + $0x10] sm:$0xff] }
0x1578   : > { %v3443_v52 = vpack.c.bf16 %v2705_v51, %v2704_v1 }
0x157a   : > { %3444 = vmatpush3.bf16.msra.mxu0 %v3443_v52 }
0x1649   : > { %v2671_v39 = vpop.f32.mrb[26].mxu1 }
0x164a   : > { %v2675_v40 = vadd.f32 %v2671_v39, %v2427_v35  ;;  %v3360_v8 = vpop.f32.mrb[27].mxu1 }
0x164c   : > { %v2676_v41 = vadd.f32 %v2675_v40, %v4314_v57  ;;  %v2785_v57 = vld [vmem:[%s4548_s30] sm:$0xff] }
0x164d   : > { %v3446_v55 = vpack.c.bf16 %v2786_v53, %v2785_v57 }
0x164e   : > { %v2677_v42 = vsel %vm458_vm1, %v2676_v41, 0.0 }
0x164f   : > { %2678 = vadd.xlane.f32.xlu0 %v2677_v42  ;;  %3447 = vmatpush3.bf16.msra.mxu1 %v3446_v55 }
0x1650   : > { %3448 = vmatprep.subr.bf16.mxu1 %v3858_v0 }
0x1653   : > { %3450 = vmatpush3.bf16.msra.mxu1 %v3449_v58 }
0x1654   : > { %3451 = vmatprep.subr.bf16.mxu1 %v3858_v0 }
0x1657   : > { %3453 = vmatpush3.bf16.msra.mxu1 %v3452_v63 }
0x1658   : > { %3454 = vmatprep.subr.bf16.mxu1 %v3858_v0  ;;  %v2791_v0 = vld [vmem:[%s4548_s30 + $0x30] sm:$0xff] }
0x1659   : > { %v3455_v13 = vpack.c.bf16 %v2792_v12, %v2791_v0 }
0x165b   : > { %3456 = vmatpush3.bf16.msra.mxu1 %v3455_v13 }
0x16dc   : > { %v2679_v43 = vpop.xlane.xlu0 %2678 }
0x16dd   : > { %v2680_v44 = vmul.f32 0.03125, %v2679_v43 }
0x16df   : > { %v2681_v45 = vsub.f32 %v2676_v41, %v2680_v44 }
0x16e1   : > { %v2682_v46 = vmul.f32 %v2681_v45, %v2681_v45 }
0x16e3   : > { %v2683_v47 = vsel %vm458_vm1, %v2682_v46, 0.0 }
0x16e4   : > { %2684 = vadd.xlane.f32.xlu1 %v2683_v47 }
0x1771   : > { %v2685_v2 = vpop.xlane.xlu1 %2684 }
0x1772   : > { %v2686_v3 = vmul.f32 0.03125, %v2685_v2 }
0x1774   : > { %v2687_v60 = vadd.f32 1e-05, %v2686_v3 }
0x1776   : > { %3629 = vrsqrt.f32 %v2687_v60 }
0x1780   : > { %v3630_v4 = vpop.eup %3629 }
0x1781   : > { %v2689_v6 = vmul.f32 %v3630_v4, %v2681_v45 }
0x1783   : > { %v2695_v10 = vmul.f32 %v3093_v5, %v2689_v6 }
0x1785   : > { %v2701_v11 = vadd.f32 %v3094_v7, %v2695_v10 }
0x1787   : > { %3370 = vmatmul.mubr.msk.f32.vlgmr.msra.gmra.mrb[26].mxu0 %vm458_vm1, %v2701_v11 }
0x185a   : > { %v2780_v15 = vpop.f32.mrb[26].mxu0 }
0x185b   : > { %v2781_v16 = vadd.f32 %v3095_v14, %v2780_v15  ;;  %v3371_v17 = vpop.f32.mrb[27].mxu0 }
0x185d   : > { %v2784_v18 = vmax.f32 %v2781_v16, 0.0 }
0x185f   : > { %3389 = vmatmul.mubr.msk.f32.vlgmr.msra.gmra.mrb[28].mxu1 %vm2798_vm5, %v2784_v18 }
0x1932   : > { %v2868_v20 = vpop.f32.mrb[28].mxu1 }
0x1933   : > { %v2869_v9 = vadd.f32 %v3097_v19, %v2868_v20  ;;  %v3390_v21 = vpop.f32.mrb[29].mxu1 }
0x1935   : > { %v2872_v22 = vadd.f32 %v2869_v9, %v2701_v11 }
0x1937   : > { %v2873_v23 = vsel %vm458_vm1, %v2872_v22, 0.0 }
0x1938   : > { %2874 = vadd.xlane.f32.xlu0 %v2873_v23 }
0x19c5   : > { %v2875_v24 = vpop.xlane.xlu0 %2874 }
0x19c6   : > { %v2876_v61 = vmul.f32 0.03125, %v2875_v24 }
0x19c8   : > { %v2877_v25 = vsub.f32 %v2872_v22, %v2876_v61 }
0x19ca   : > { %v2878_v26 = vmul.f32 %v2877_v25, %v2877_v25 }
0x19cc   : > { %v2879_v27 = vsel %vm458_vm1, %v2878_v26, 0.0 }
0x19cd   : > { %2880 = vadd.xlane.f32.xlu0 %v2879_v27 }
0x1a5a   : > { %v2881_v28 = vpop.xlane.xlu0 %2880 }
0x1a5b   : > { %v2882_v29 = vmul.f32 0.03125, %v2881_v28 }
0x1a5d   : > { %v2883_v30 = vadd.f32 1e-05, %v2882_v29 }
0x1a5f   : > { %3631 = vrsqrt.f32 %v2883_v30 }
0x1a69   : > { %v3632_v31 = vpop.eup %3631 }
0x1a6a   : > { %v2885_v33 = vmul.f32 %v3632_v31, %v2877_v25 }
0x1a6c   : > { %v2891_v35 = vmul.f32 %v3099_v32, %v2885_v33 }
0x1a6e   : > { %v2897_v36 = vadd.f32 %v3100_v34, %v2891_v35 }
0x1a70   : > { %2898 = vst.msk [vmem:[%s447_s23] sm:$0xff] %vm458_vm1, %v2897_v36 }
0x1a71   : > { %3788 = shalt.err (!%p3785_p2)
}
0x1a72   : > { %s3789_s4 = scalar_lea.hbm %s4467_s21, 128  ;;  %s3793_s23 = scalar_lea.hbm %s4549_s17, 256 }
0x1a73   : > { %p3790_p8 = scmp.ne.s32.totalorder %s4467_s21, %s3789_s4  ;;  %p3794_p11 = scmp.lt.u32.totalorder %s4467_s21, %s4549_s17 }
0x1a74   : > { %p3795_p1 = scmp.lt.u32.totalorder %s3793_s23, %s3789_s4  ;;  %p3797_p5 = scmp.lt.u32.totalorder %s3789_s4, %s4467_s21 }
0x1a75   : > { %p3791_p4 = pnand %p3790_p8, %p4550_p7 }
0x1a76   : > { %p3796_p6 = por %p3795_p1, %p3794_p11 }
0x1a77   : > { %p3792_p10 = pneg %p3791_p4 }
0x1a78   : > { %p3798_p9 = por %p3797_p5, %p3796_p6 }
0x1a7a   : > { %p3799_p12 = pnand %p3798_p9, %p3792_p10 }
0x1a7c   : > { %3802 = shalt.err (!%p3799_p12)
}
0x1a7d   : > { %3475 = dma.vmem_to_hbm [thread:$0]  (%p4550_p7), %s4469_s10, 128, %s4467_s21, %s2900_s24  }
0x1a7e PF: > { %s2925_s18 = sand.u32 1, %s3837_s13   ;;  %p4551_p3 = scmp.ne.s32.totalorder %s4539_s12, 0 }
0x1a7f   : > { %p4552_p13 = scmp.ge.s32.totalorder %s3849_s16, 2  ;;  %s2926_s19 = scalar_lea.sflag [#allocation4], %s2925_s18 }
0x1a81   : > { %p3495_p0 = pnand %p4552_p13, %p4551_p3 }
0x1a83   : > { %3832 = dma.done.wait (!%p3495_p0), %s2926_s19, 128  }
0x1a84   : > { %3834 = vsyncadd (!%p3495_p0), %s2926_s19, 4294967168  ;;  %p25_p2 = scmp.ge.s32.totalorder %s4080_s11, 4   ;;  %s4553_s13 = smov %s3841_s14 }
0x1a85   : > { %s4554_s14 = smov %s3845_s15  ;;  %s4555_s15 = smov %s4091_s29 }
0x1a86   : > { %s4556_s16 = smov %s4080_s11  ;;  %27 = sbr.rel (!%p25_p2) target bundleno = 11 (0xb), region = 124 }
0x1a8d   :  { %2931 = vsyncpa [#allocation3], 1 }
0x1a8e   :  { %2933 = vsyncpa [#allocation3 + $0x1], 1 }
0x1a8f   :  { %2934 = vsyncpa [#allocation6], 1 }
0x1a90   :  { %2935 = vsyncpa [#allocation9], 1 }
0x1a91   :  { %2936 = vsyncpa [#allocation4], 1 }
0x1a92   :  { %2938 = vsyncpa [#allocation4 + $0x1], 1 }

</bundles_post_ra>
